<compile_context>
chip_gen: v7x
topology: tpu7x:2x2x1
jax: 0.10.0
libtpu: 0.0.40
codegen_flags: <defaults>
</compile_context>

<pallas_src>
import functools

import jax
import jax.numpy as jnp
from jax.experimental import pallas as pl
from jax.experimental.pallas import tpu as pltpu


# ----------------------------------------------------------------------------
# Fused Pallas kernel: the entire EdgeConv encoder (all layers) in one call.
# ----------------------------------------------------------------------------
def fused_encoder_kernel(gd_ref, gs_ref, x_ref, deg_ref,
                         w1a_ref, w1b_ref, b1_ref, w2_ref, b2_ref,
                         o_ref, *, n_layers):
    gd = gd_ref[...].astype(jnp.float32)   # (Ep, Np) one-hot dst rows (exact 0/1, stored bf16)
    gs = gs_ref[...].astype(jnp.float32)   # (Ep, Np) one-hot src rows
    deg = deg_ref[...]                     # (Np, 1)  per-node in-degree
    h = x_ref[...]                         # (Np, Cp) node features (f32)

    for l in range(n_layers):              # static unroll over layers (weights stacked on axis 0)
        # Gather x[dst] and x[src] on the MXU.
        xi = jnp.dot(gd, h, preferred_element_type=jnp.float32)     # (Ep, Cp)
        xj = jnp.dot(gs, h, preferred_element_type=jnp.float32)     # (Ep, Cp)

        # Linear(2*Cin, Cout) on [x_i, x_j - x_i] with pre-folded split weights
        # (W1a' = W1a - W1b), so no per-edge subtraction is needed.
        m = (jnp.dot(xi, w1a_ref[l], preferred_element_type=jnp.float32)
             + jnp.dot(xj, w1b_ref[l], preferred_element_type=jnp.float32)
             + b1_ref[l])
        m = jnp.maximum(m, 0.0)                                      # ReLU

        # Scatter-add to destination nodes: gd^T @ m, contracting the edge axis
        # directly on the MXU (no materialized transpose, no separate sd operand).
        agg = jax.lax.dot_general(gd, m, (((0,), (0,)), ((), ())),
                                  preferred_element_type=jnp.float32)  # (Np, Cp)

        # Second Linear with BatchNorm folded in, reassociated after the scatter:
        # out = agg @ W2' + deg * b2'   (exact; deg is the per-node in-degree).
        h = (jnp.dot(agg, w2_ref[l], preferred_element_type=jnp.float32)
             + deg * b2_ref[l])

        if l < n_layers - 1:
            # Inter-layer: ReLU + F.normalize(dim=-1); Dropout = identity in eval mode.
            h = jnp.maximum(h, 0.0)
            ss = jnp.sum(h * h, axis=-1, keepdims=True)
            h = h * jax.lax.rsqrt(jnp.maximum(ss, 1e-24))  # == x / max(||x||, 1e-12)

    o_ref[...] = h


# ----------------------------------------------------------------------------
# Wrapper: one-hot edge matrices, constant folding, padding, single pallas_call.
# ----------------------------------------------------------------------------
def _round_up(v, m):
    return ((v + m - 1) // m) * m


def _pad2(a, rows, cols):
    return jnp.pad(a, ((0, rows - a.shape[0]), (0, cols - a.shape[1])))


def _fold_layer_params(p, c_in, cp):
    """Fold BN into Linear2, fold the concat Linear, pad everything to (cp, cp)."""
    w1a = p["w1"][:c_in, :]
    w1b = p["w1"][c_in:, :]
    w1a_f = w1a - w1b                                      # [xi, xj-xi]@W1 == xi@(W1a-W1b)+xj@W1b
    w2_f = p["bn_scale"][:, None] * p["w2"]                # BN scale folded into W2 rows
    b2_f = p["bn_shift"] @ p["w2"] + p["b2"]               # BN shift folded into bias
    return (_pad2(w1a_f, cp, cp),
            _pad2(w1b, cp, cp),
            _pad2(p["b1"].reshape(1, -1), 1, cp),
            _pad2(w2_f, cp, cp),
            _pad2(b2_f.reshape(1, -1), 1, cp))


def edgeconv_encoder(x, edge_index, edge_feature, params_list):
    # edge_feature is accepted but unused, matching the reference forward().
    del edge_feature
    n, c_in = x.shape
    e = edge_index.shape[1]
    c_out = params_list[-1]["w2"].shape[0]
    n_layers = len(params_list)

    cp = _round_up(max(c_in, c_out), 128)   # lane-dense channel dim
    npad = _round_up(n, 128)                # node dim padded for MXU / lane alignment
    epad = _round_up(e, 128)                # edge dim padded to >=128 matmul rows

    src = edge_index[0]  # x_j
    dst = edge_index[1]  # x_i / aggregation target
    node_ids = jnp.arange(n)
    gd = (dst[:, None] == node_ids[None, :]).astype(jnp.float32)   # (E, N)
    gs = (src[:, None] == node_ids[None, :]).astype(jnp.float32)   # (E, N)
    deg = jnp.sum(gd, axis=0).reshape(n, 1)                        # in-degree per node

    gd_p = _pad2(gd, epad, npad).astype(jnp.bfloat16)   # exact 0/1 -> lossless bf16
    gs_p = _pad2(gs, epad, npad).astype(jnp.bfloat16)
    x_p = _pad2(x.astype(jnp.float32), npad, cp)
    deg_p = _pad2(deg, npad, 1)

    folded = [_fold_layer_params(p, (c_in if i == 0 else c_out), cp)
              for i, p in enumerate(params_list)]
    w1a = jnp.stack([f[0] for f in folded])   # (L, cp, cp)
    w1b = jnp.stack([f[1] for f in folded])   # (L, cp, cp)
    b1 = jnp.stack([f[2] for f in folded])    # (L, 1,  cp)
    w2 = jnp.stack([f[3] for f in folded])    # (L, cp, cp)
    b2 = jnp.stack([f[4] for f in folded])    # (L, 1,  cp)

    operands = (gd_p, gs_p, x_p, deg_p, w1a, w1b, b1, w2, b2)
    kernel = functools.partial(fused_encoder_kernel, n_layers=n_layers)

    out = pl.pallas_call(
        kernel,
        out_shape=jax.ShapeDtypeStruct((npad, cp), jnp.float32),
        in_specs=[pl.BlockSpec(memory_space=pltpu.MemorySpace.VMEM)
                  for _ in operands],
        out_specs=pl.BlockSpec(memory_space=pltpu.MemorySpace.VMEM),
    )(*operands)
    return out[:n, :c_out]


# ----------------------------------------------------------------------------
# Deterministic parameter construction (matches nn.Linear / BatchNorm1d shapes)
# ----------------------------------------------------------------------------
def make_layer_params(key, in_channels, out_channels):
    k1, k2, k3, k4 = jax.random.split(key, 4)
    fan1 = 2 * in_channels
    bound1 = 1.0 / jnp.sqrt(fan1)
    bound2 = 1.0 / jnp.sqrt(out_channels)
    w1 = jax.random.uniform(k1, (fan1, out_channels), jnp.float32, -bound1, bound1)
    b1 = jax.random.uniform(k2, (out_channels,), jnp.float32, -bound1, bound1)
    w2 = jax.random.uniform(k3, (out_channels, out_channels), jnp.float32, -bound2, bound2)
    b2 = jax.random.uniform(k4, (out_channels,), jnp.float32, -bound2, bound2)
    # BatchNorm1d defaults (eval): gamma=1, beta=0, running_mean=0, running_var=1, eps=1e-5
    gamma = jnp.ones((out_channels,), jnp.float32)
    beta = jnp.zeros((out_channels,), jnp.float32)
    r_mean = jnp.zeros((out_channels,), jnp.float32)
    r_var = jnp.ones((out_channels,), jnp.float32)
    eps = 1e-5
    bn_scale = gamma / jnp.sqrt(r_var + eps)
    bn_shift = beta - r_mean * bn_scale
    return {"w1": w1, "b1": b1, "w2": w2, "b2": b2,
            "bn_scale": bn_scale, "bn_shift": bn_shift}


# ----------------------------------------------------------------------------
# Pure-JAX reference (mirrors the PyTorch eval-mode forward) for correctness.
# ----------------------------------------------------------------------------
def reference(x, edge_index, params_list):
    src, dst = edge_index[0], edge_index[1]

    def layer(h, p):
        xi = h[dst]
        xj = h[src]
        m = jnp.concatenate([xi, xj - xi], axis=-1)
        m = jnp.maximum(m @ p["w1"] + p["b1"], 0.0)
        m = m * p["bn_scale"] + p["bn_shift"]
        m = m @ p["w2"] + p["b2"]
        return jnp.zeros((h.shape[0], m.shape[1]), m.dtype).at[dst].add(m)

    h = x
    for p in params_list[:-1]:
        h = layer(h, p)
        h = jnp.maximum(h, 0.0)
        h = h / jnp.maximum(jnp.linalg.norm(h, axis=-1, keepdims=True), 1e-12)
    return layer(h, params_list[-1])


if __name__ == "__main__":
    # TODO(synk): training-mode Dropout / batch-stat BatchNorm are stochastic /
    # batch-dependent; this implements deterministic eval-mode forward semantics.
    N, C_IN, C_OUT, E = 16, 8, 32, 32

    key = jax.random.PRNGKey(0)
    kx, ks, kd, kf, kp1, kp2 = jax.random.split(key, 6)
    x = jax.random.normal(kx, (N, C_IN), jnp.float32)
    src = jax.random.randint(ks, (E,), 0, N)
    dst = jax.random.randint(kd, (E,), 0, N)
    edge_index = jnp.stack([src, dst])                         # (2, E)
    edge_feature = jax.random.normal(kf, (E, 4), jnp.float32)  # unused by forward

    params_list = [make_layer_params(kp1, C_IN, C_OUT),
                   make_layer_params(kp2, C_OUT, C_OUT)]

    out = jax.block_until_ready(edgeconv_encoder(x, edge_index, edge_feature, params_list))

    ref = reference(x, edge_index, params_list)
    assert out.shape == (N, C_OUT)
    assert jnp.allclose(out, ref, atol=2e-4, rtol=2e-4), "Pallas kernel mismatch vs reference"
    print("KERNEL_OK")
</pallas_src>

<mosaic_0001>
module attributes {stable_mosaic.version = 11 : i64} {
  func.func @fused_encoder_kernel(%arg0: memref<128x128xbf16, #tpu.memory_space<vmem>>, %arg1: memref<128x128xbf16, #tpu.memory_space<vmem>>, %arg2: memref<128x128xf32, #tpu.memory_space<vmem>>, %arg3: memref<128x1xf32, #tpu.memory_space<vmem>>, %arg4: memref<2x128x128xf32, #tpu.memory_space<vmem>>, %arg5: memref<2x128x128xf32, #tpu.memory_space<vmem>>, %arg6: memref<2x1x128xf32, #tpu.memory_space<vmem>>, %arg7: memref<2x128x128xf32, #tpu.memory_space<vmem>>, %arg8: memref<2x1x128xf32, #tpu.memory_space<vmem>>, %arg9: memref<128x128xf32, #tpu.memory_space<vmem>>) attributes {dimension_semantics = [], scalar_prefetch = 0 : i64, scratch_operands = 0 : i64, tpu.core_type = #tpu.core_type<tc>} {
    %c0 = arith.constant 0 : index
    %c0_0 = arith.constant 0 : index
    %0 = vector.load %arg0[%c0, %c0_0] : memref<128x128xbf16, #tpu.memory_space<vmem>>, vector<128x128xbf16>
    %1 = arith.extf %0 : vector<128x128xbf16> to vector<128x128xf32>
    %c0_1 = arith.constant 0 : index
    %c0_2 = arith.constant 0 : index
    %2 = vector.load %arg1[%c0_1, %c0_2] : memref<128x128xbf16, #tpu.memory_space<vmem>>, vector<128x128xbf16>
    %3 = arith.extf %2 : vector<128x128xbf16> to vector<128x128xf32>
    %c0_3 = arith.constant 0 : index
    %c0_4 = arith.constant 0 : index
    %4 = vector.load %arg3[%c0_3, %c0_4] : memref<128x1xf32, #tpu.memory_space<vmem>>, vector<128x1xf32>
    %c0_5 = arith.constant 0 : index
    %c0_6 = arith.constant 0 : index
    %5 = vector.load %arg2[%c0_5, %c0_6] : memref<128x128xf32, #tpu.memory_space<vmem>>, vector<128x128xf32>
    %cst = arith.constant dense<0.000000e+00> : vector<128x128xf32>
    %6 = tpu.matmul %1, %5, %cst {dimension_numbers = #tpu.dot_dimension_numbers<[1], [0], [0], [1], [0, 0, 1, 1], [], []>} : vector<128x128xf32>, vector<128x128xf32>, vector<128x128xf32> -> vector<128x128xf32>
    %cst_7 = arith.constant dense<0.000000e+00> : vector<128x128xf32>
    %7 = tpu.matmul %3, %5, %cst_7 {dimension_numbers = #tpu.dot_dimension_numbers<[1], [0], [0], [1], [0, 0, 1, 1], [], []>} : vector<128x128xf32>, vector<128x128xf32>, vector<128x128xf32> -> vector<128x128xf32>
    %c0_8 = arith.constant 0 : index
    %c0_9 = arith.constant 0 : index
    %c0_10 = arith.constant 0 : index
    %8 = vector.load %arg4[%c0_8, %c0_9, %c0_10] : memref<2x128x128xf32, #tpu.memory_space<vmem>>, vector<1x128x128xf32>
    %9 = vector.shape_cast %8 : vector<1x128x128xf32> to vector<128x128xf32>
    %cst_11 = arith.constant dense<0.000000e+00> : vector<128x128xf32>
    %10 = tpu.matmul %6, %9, %cst_11 {dimension_numbers = #tpu.dot_dimension_numbers<[1], [0], [0], [1], [0, 0, 1, 1], [], []>} : vector<128x128xf32>, vector<128x128xf32>, vector<128x128xf32> -> vector<128x128xf32>
    %c0_12 = arith.constant 0 : index
    %c0_13 = arith.constant 0 : index
    %c0_14 = arith.constant 0 : index
    %11 = vector.load %arg5[%c0_12, %c0_13, %c0_14] : memref<2x128x128xf32, #tpu.memory_space<vmem>>, vector<1x128x128xf32>
    %12 = vector.shape_cast %11 : vector<1x128x128xf32> to vector<128x128xf32>
    %cst_15 = arith.constant dense<0.000000e+00> : vector<128x128xf32>
    %13 = tpu.matmul %7, %12, %cst_15 {dimension_numbers = #tpu.dot_dimension_numbers<[1], [0], [0], [1], [0, 0, 1, 1], [], []>} : vector<128x128xf32>, vector<128x128xf32>, vector<128x128xf32> -> vector<128x128xf32>
    %14 = arith.addf %10, %13 : vector<128x128xf32>
    %c0_16 = arith.constant 0 : index
    %c0_17 = arith.constant 0 : index
    %c0_18 = arith.constant 0 : index
    %15 = vector.load %arg6[%c0_16, %c0_17, %c0_18] : memref<2x1x128xf32, #tpu.memory_space<vmem>>, vector<1x1x128xf32>
    %16 = vector.shape_cast %15 : vector<1x1x128xf32> to vector<1x128xf32>
    %17 = vector.broadcast %16 : vector<1x128xf32> to vector<128x128xf32>
    %18 = arith.addf %14, %17 : vector<128x128xf32>
    %cst_19 = arith.constant 0.000000e+00 : f32
    %19 = vector.broadcast %cst_19 : f32 to vector<128x128xf32>
    %20 = arith.maximumf %18, %19 : vector<128x128xf32>
    %cst_20 = arith.constant dense<0.000000e+00> : vector<128x128xf32>
    %21 = tpu.matmul %1, %20, %cst_20 {dimension_numbers = #tpu.dot_dimension_numbers<[0], [0], [1], [1], [0, 1, 1, 1], [], []>} : vector<128x128xf32>, vector<128x128xf32>, vector<128x128xf32> -> vector<128x128xf32>
    %c0_21 = arith.constant 0 : index
    %c0_22 = arith.constant 0 : index
    %c0_23 = arith.constant 0 : index
    %22 = vector.load %arg7[%c0_21, %c0_22, %c0_23] : memref<2x128x128xf32, #tpu.memory_space<vmem>>, vector<1x128x128xf32>
    %23 = vector.shape_cast %22 : vector<1x128x128xf32> to vector<128x128xf32>
    %cst_24 = arith.constant dense<0.000000e+00> : vector<128x128xf32>
    %24 = tpu.matmul %21, %23, %cst_24 {dimension_numbers = #tpu.dot_dimension_numbers<[1], [0], [0], [1], [0, 0, 1, 1], [], []>} : vector<128x128xf32>, vector<128x128xf32>, vector<128x128xf32> -> vector<128x128xf32>
    %c0_25 = arith.constant 0 : index
    %c0_26 = arith.constant 0 : index
    %c0_27 = arith.constant 0 : index
    %25 = vector.load %arg8[%c0_25, %c0_26, %c0_27] : memref<2x1x128xf32, #tpu.memory_space<vmem>>, vector<1x1x128xf32>
    %26 = vector.shape_cast %25 : vector<1x1x128xf32> to vector<1x128xf32>
    %27 = vector.broadcast %4 : vector<128x1xf32> to vector<128x128xf32>
    %28 = vector.broadcast %26 : vector<1x128xf32> to vector<128x128xf32>
    %29 = arith.mulf %27, %28 : vector<128x128xf32>
    %30 = arith.addf %24, %29 : vector<128x128xf32>
    %cst_28 = arith.constant 0.000000e+00 : f32
    %31 = vector.broadcast %cst_28 : f32 to vector<128x128xf32>
    %32 = arith.maximumf %30, %31 : vector<128x128xf32>
    %33 = arith.mulf %32, %32 : vector<128x128xf32>
    %cst_29 = arith.constant dense<0.000000e+00> : vector<128xf32>
    %34 = vector.multi_reduction <add>, %33, %cst_29 [1] : vector<128x128xf32> to vector<128xf32>
    %35 = vector.shape_cast %34 : vector<128xf32> to vector<128x1xf32>
    %cst_30 = arith.constant 1.000000e-24 : f32
    %36 = vector.broadcast %cst_30 : f32 to vector<128x1xf32>
    %37 = arith.maximumf %35, %36 : vector<128x1xf32>
    %38 = math.rsqrt %37 : vector<128x1xf32>
    %39 = vector.broadcast %38 : vector<128x1xf32> to vector<128x128xf32>
    %40 = arith.mulf %32, %39 : vector<128x128xf32>
    %cst_31 = arith.constant dense<0.000000e+00> : vector<128x128xf32>
    %41 = tpu.matmul %1, %40, %cst_31 {dimension_numbers = #tpu.dot_dimension_numbers<[1], [0], [0], [1], [0, 0, 1, 1], [], []>} : vector<128x128xf32>, vector<128x128xf32>, vector<128x128xf32> -> vector<128x128xf32>
    %cst_32 = arith.constant dense<0.000000e+00> : vector<128x128xf32>
    %42 = tpu.matmul %3, %40, %cst_32 {dimension_numbers = #tpu.dot_dimension_numbers<[1], [0], [0], [1], [0, 0, 1, 1], [], []>} : vector<128x128xf32>, vector<128x128xf32>, vector<128x128xf32> -> vector<128x128xf32>
    %c1 = arith.constant 1 : index
    %c0_33 = arith.constant 0 : index
    %c0_34 = arith.constant 0 : index
    %43 = vector.load %arg4[%c1, %c0_33, %c0_34] : memref<2x128x128xf32, #tpu.memory_space<vmem>>, vector<1x128x128xf32>
    %44 = vector.shape_cast %43 : vector<1x128x128xf32> to vector<128x128xf32>
    %cst_35 = arith.constant dense<0.000000e+00> : vector<128x128xf32>
    %45 = tpu.matmul %41, %44, %cst_35 {dimension_numbers = #tpu.dot_dimension_numbers<[1], [0], [0], [1], [0, 0, 1, 1], [], []>} : vector<128x128xf32>, vector<128x128xf32>, vector<128x128xf32> -> vector<128x128xf32>
    %c1_36 = arith.constant 1 : index
    %c0_37 = arith.constant 0 : index
    %c0_38 = arith.constant 0 : index
    %46 = vector.load %arg5[%c1_36, %c0_37, %c0_38] : memref<2x128x128xf32, #tpu.memory_space<vmem>>, vector<1x128x128xf32>
    %47 = vector.shape_cast %46 : vector<1x128x128xf32> to vector<128x128xf32>
    %cst_39 = arith.constant dense<0.000000e+00> : vector<128x128xf32>
    %48 = tpu.matmul %42, %47, %cst_39 {dimension_numbers = #tpu.dot_dimension_numbers<[1], [0], [0], [1], [0, 0, 1, 1], [], []>} : vector<128x128xf32>, vector<128x128xf32>, vector<128x128xf32> -> vector<128x128xf32>
    %49 = arith.addf %45, %48 : vector<128x128xf32>
    %c1_40 = arith.constant 1 : index
    %c0_41 = arith.constant 0 : index
    %c0_42 = arith.constant 0 : index
    %50 = vector.load %arg6[%c1_40, %c0_41, %c0_42] : memref<2x1x128xf32, #tpu.memory_space<vmem>>, vector<1x1x128xf32>
    %51 = vector.shape_cast %50 : vector<1x1x128xf32> to vector<1x128xf32>
    %52 = vector.broadcast %51 : vector<1x128xf32> to vector<128x128xf32>
    %53 = arith.addf %49, %52 : vector<128x128xf32>
    %cst_43 = arith.constant 0.000000e+00 : f32
    %54 = vector.broadcast %cst_43 : f32 to vector<128x128xf32>
    %55 = arith.maximumf %53, %54 : vector<128x128xf32>
    %cst_44 = arith.constant dense<0.000000e+00> : vector<128x128xf32>
    %56 = tpu.matmul %1, %55, %cst_44 {dimension_numbers = #tpu.dot_dimension_numbers<[0], [0], [1], [1], [0, 1, 1, 1], [], []>} : vector<128x128xf32>, vector<128x128xf32>, vector<128x128xf32> -> vector<128x128xf32>
    %c1_45 = arith.constant 1 : index
    %c0_46 = arith.constant 0 : index
    %c0_47 = arith.constant 0 : index
    %57 = vector.load %arg7[%c1_45, %c0_46, %c0_47] : memref<2x128x128xf32, #tpu.memory_space<vmem>>, vector<1x128x128xf32>
    %58 = vector.shape_cast %57 : vector<1x128x128xf32> to vector<128x128xf32>
    %cst_48 = arith.constant dense<0.000000e+00> : vector<128x128xf32>
    %59 = tpu.matmul %56, %58, %cst_48 {dimension_numbers = #tpu.dot_dimension_numbers<[1], [0], [0], [1], [0, 0, 1, 1], [], []>} : vector<128x128xf32>, vector<128x128xf32>, vector<128x128xf32> -> vector<128x128xf32>
    %c1_49 = arith.constant 1 : index
    %c0_50 = arith.constant 0 : index
    %c0_51 = arith.constant 0 : index
    %60 = vector.load %arg8[%c1_49, %c0_50, %c0_51] : memref<2x1x128xf32, #tpu.memory_space<vmem>>, vector<1x1x128xf32>
    %61 = vector.shape_cast %60 : vector<1x1x128xf32> to vector<1x128xf32>
    %62 = vector.broadcast %4 : vector<128x1xf32> to vector<128x128xf32>
    %63 = vector.broadcast %61 : vector<1x128xf32> to vector<128x128xf32>
    %64 = arith.mulf %62, %63 : vector<128x128xf32>
    %65 = arith.addf %59, %64 : vector<128x128xf32>
    %c0_52 = arith.constant 0 : index
    %c0_53 = arith.constant 0 : index
    %66 = vector.load %arg9[%c0_52, %c0_53] : memref<128x128xf32, #tpu.memory_space<vmem>>, vector<128x128xf32>
    tpu.vector_store %arg9[%c0_52, %c0_53], %65 {strides = array<i32>} : memref<128x128xf32, #tpu.memory_space<vmem>>, vector<128x128xf32>,
    return
  }
}

</mosaic_0001>

<bundles_post_ra>
// kernel: tpu_custom_call.1
= control target key start
LH: loop header
LB: loop body
LE: loop exit
PB: predicated region body
PF: predicated region fallthrough
CT: control target
= control target key end

     0   :  { %14 = vsyncpa [#allocation3], 0  ;;  %s4886_s0 = inlined_call_operand.hbm [shape: bf16[128,128], index: 0, kind: input, shape index: {}]   ;;  %s4887_s1 = inlined_call_operand.hbm [shape: bf16[128,128], index: 1, kind: input, shape index: {}]   ;;  %s4888_s2 = inlined_call_operand.vmem [shape: f32[128,128], index: 2, kind: input, shape index: {}]   ;;  %s4889_s3 = inlined_call_operand.vmem [shape: f32[128,1], index: 3, kind: input, shape index: {}]   ;;  %s4890_s4 = inlined_call_operand.hbm [shape: f32[2,128,128], index: 4, kind: input, shape index: {}]   ;;  %s4891_s5 = inlined_call_operand.hbm [shape: f32[2,128,128], index: 5, kind: input, shape index: {}]   ;;  %s4892_s6 = inlined_call_operand.vmem [shape: f32[2,1,128], index: 6, kind: input, shape index: {}]   ;;  %s4893_s7 = inlined_call_operand.hbm [shape: f32[2,128,128], index: 7, kind: input, shape index: {}]   ;;  %s4894_s8 = inlined_call_operand.vmem [shape: f32[2,1,128], index: 8, kind: input, shape index: {}]   ;;  %s4895_s9 = inlined_call_operand.hbm [shape: f32[128,128], index: 9, kind: output, shape index: {}]  }
   0x1   :  { %15 = vsyncpa [#allocation6], 0 }
   0x2   :  { %16 = vsyncpa [#allocation9], 0 }
   0x3   :  { %17 = vsyncpa [#allocation4], 0  ;;  %s4162_s30 = smov [#allocation5]   ;;  %s4022_s13 = scalar_lea.hbm %s4887_s1, 1024 }
   0x4   :  { %s35_s10 = sshll.u32 %s4162_s30, 4  ;;  %p4023_p0 = scmp.ne.s32.totalorder %s4887_s1, %s4022_s13  ;;  %s36_s10 = int_to_ptr.vmem [resolvable:$true] %s35_s10 }
   0x5   :  { %p4026_p1 = scmp.lt.u32.totalorder %s4022_s13, %s4887_s1 }
   0x7   :  { %p4028_p2 = pnand %p4026_p1, %p4023_p0 }
   0x9   :  { %4031 = shalt.err (!%p4028_p2)
}
   0xa   :  { %s4032_s18 = scalar_lea.vmem %s36_s10, 1024  ;;  %p4037_p4 = scmp.lt.s32.totalorder %s36_s10, %s36_s10 }
   0xb   :  { %p4033_p3 = scmp.ne.s32.totalorder %s36_s10, %s4032_s18  ;;  %p4038_p5 = scmp.lt.s32.totalorder %s4032_s18, %s4032_s18 }
   0xd   :  { %p4039_p6 = por %p4038_p5, %p4037_p4 }
   0xf   :  { %p4040_p7 = pnand %p4039_p6, %p4033_p3 }
  0x11   :  { %4043 = shalt.err (!%p4040_p7)
}
  0x12   :  { %s4163_s19 = smov 64   ;;  %s4164_s20 = smov 4  }
  0x13   :  { %41 = dma.hbm_to_vmem [thread:$0]  %s4887_s1, 1024, %s36_s10, [#allocation6], %s4163_s19, %s4163_s19, %s4164_s20  }
  0x14   :  { %s4165_s23 = smov [#allocation8]   ;;  %s4166_s25 = smov [#allocation2]  }
  0x15   :  { %s63_s24 = sshll.u32 %s4165_s23, 4  ;;  %s23_s26 = sshll.u32 %s4166_s25, 4  ;;  %s64_s24 = int_to_ptr.vmem [resolvable:$true] %s63_s24  ;;  %s24_s26 = int_to_ptr.vmem [resolvable:$true] %s23_s26 }
  0x16   :  { %s4044_s29 = scalar_lea.hbm %s4891_s5, 4096 }
  0x17   :  { %p4045_p8 = scmp.ne.s32.totalorder %s4891_s5, %s4044_s29  ;;  %p4048_p9 = scmp.lt.u32.totalorder %s4044_s29, %s4891_s5 }
  0x19   :  { %p4050_p10 = pnand %p4048_p9, %p4045_p8 }
  0x1b   :  { %4053 = shalt.err (!%p4050_p10)
}
  0x1c   :  { %s4054_s1 = scalar_lea.vmem %s64_s24, 4096  ;;  %p4059_p12 = scmp.lt.s32.totalorder %s64_s24, %s64_s24 }
  0x1d   :  { %p4055_p11 = scmp.ne.s32.totalorder %s64_s24, %s4054_s1  ;;  %p4060_p13 = scmp.lt.s32.totalorder %s4054_s1, %s4054_s1 }
  0x1f   :  { %p4061_p0 = por %p4060_p13, %p4059_p12 }
  0x21   :  { %p4062_p1 = pnand %p4061_p0, %p4055_p11 }
  0x23   :  { %4065 = shalt.err (!%p4062_p1)
}
  0x24   :  { %s4167_s10 = smov 128   ;;  %s4168_s14 = smov 8  }
  0x25   :  { %69 = dma.hbm_to_vmem [thread:$0]  %s4891_s5, 4096, %s64_s24, [#allocation9], %s4167_s10, %s4167_s10, %s4168_s14  }
  0x26   :  { %s4066_s21 = scalar_lea.hbm %s4886_s0, 1024 }
  0x27   :  { %p4067_p2 = scmp.ne.s32.totalorder %s4886_s0, %s4066_s21  ;;  %p4070_p3 = scmp.lt.u32.totalorder %s4066_s21, %s4886_s0 }
  0x29   :  { %p4072_p4 = pnand %p4070_p3, %p4067_p2 }
  0x2b   :  { %4075 = shalt.err (!%p4072_p4)
}
  0x2c   :  { %s4076_s28 = scalar_lea.vmem %s24_s26, 1024  ;;  %p4081_p6 = scmp.lt.s32.totalorder %s24_s26, %s24_s26 }
  0x2d   :  { %p4077_p5 = scmp.ne.s32.totalorder %s24_s26, %s4076_s28  ;;  %p4082_p7 = scmp.lt.s32.totalorder %s4076_s28, %s4076_s28 }
  0x2f   :  { %p4083_p8 = por %p4082_p7, %p4081_p6 }
  0x31   :  { %p4084_p9 = pnand %p4083_p8, %p4077_p5 }
  0x33   :  { %4087 = shalt.err (!%p4084_p9)
}
  0x34   :  { %29 = dma.hbm_to_vmem [thread:$0]  %s4886_s0, 1024, %s24_s26, [#allocation3], %s4163_s19, %s4163_s19, %s4164_s20  }
  0x35   :  { %s4169_s29 = smov [#allocation7]   ;;  %s4170_s11 = smov [#allocation10]  }
  0x36   :  { %s51_s30 = sshll.u32 %s4169_s29, 4  ;;  %s77_s12 = sshll.u32 %s4170_s11, 4  ;;  %s52_s30 = int_to_ptr.vmem [resolvable:$true] %s51_s30  ;;  %s78_s12 = int_to_ptr.vmem [resolvable:$true] %s77_s12 }
  0x37   :  { %s4088_s15 = scalar_lea.hbm %s4890_s4, 4096 }
  0x38   :  { %p4089_p10 = scmp.ne.s32.totalorder %s4890_s4, %s4088_s15  ;;  %p4092_p11 = scmp.lt.u32.totalorder %s4088_s15, %s4890_s4 }
  0x3a   :  { %p4094_p12 = pnand %p4092_p11, %p4089_p10 }
  0x3c   :  { %4097 = shalt.err (!%p4094_p12)
}
  0x3d   :  { %s4098_s0 = scalar_lea.vmem %s52_s30, 4096  ;;  %p4103_p0 = scmp.lt.s32.totalorder %s52_s30, %s52_s30 }
  0x3e   :  { %p4099_p13 = scmp.ne.s32.totalorder %s52_s30, %s4098_s0  ;;  %p4104_p1 = scmp.lt.s32.totalorder %s4098_s0, %s4098_s0 }
  0x40   :  { %p4105_p2 = por %p4104_p1, %p4103_p0 }
  0x42   :  { %p4106_p3 = pnand %p4105_p2, %p4099_p13 }
  0x44   :  { %4109 = shalt.err (!%p4106_p3)
}
  0x45   :  { %57 = dma.hbm_to_vmem [thread:$0]  %s4890_s4, 4096, %s52_s30, [#allocation6], %s4167_s10, %s4167_s10, %s4168_s14  }
  0x46   :  { %s4110_s23 = scalar_lea.hbm %s4893_s7, 4096 }
  0x47   :  { %p4111_p4 = scmp.ne.s32.totalorder %s4893_s7, %s4110_s23  ;;  %p4114_p5 = scmp.lt.u32.totalorder %s4110_s23, %s4893_s7 }
  0x49   :  { %p4116_p6 = pnand %p4114_p5, %p4111_p4 }
  0x4b   :  { %4119 = shalt.err (!%p4116_p6)
}
  0x4c   :  { %s4120_s24 = scalar_lea.vmem %s78_s12, 4096  ;;  %p4125_p8 = scmp.lt.s32.totalorder %s78_s12, %s78_s12 }
  0x4d   :  { %p4121_p7 = scmp.ne.s32.totalorder %s78_s12, %s4120_s24  ;;  %p4126_p9 = scmp.lt.s32.totalorder %s4120_s24, %s4120_s24 }
  0x4f   :  { %p4127_p10 = por %p4126_p9, %p4125_p8 }
  0x51   :  { %p4128_p11 = pnand %p4127_p10, %p4121_p7 }
  0x53   :  { %4131 = shalt.err (!%p4128_p11)
}
  0x54   :  { %83 = dma.hbm_to_vmem [thread:$0]  %s4893_s7, 4096, %s78_s12, [#allocation9], %s4167_s10, %s4167_s10, %s4168_s14  }
  0x55   :  { %4154 = dma.done.wait [#allocation3], 1024  }
  0x56   :  { %4155 = vsyncadd [#allocation3], 4294966272 }
  0x57   :  { %4156 = dma.done.wait [#allocation6], 5120  }
  0x58   :  { %4157 = vsyncadd [#allocation6], 4294962176 }
  0x59   :  { %4158 = dma.done.wait [#allocation9], 8192  }
  0x5a   :  { %4159 = vsyncadd [#allocation9], 4294959104  ;;  %v181_v0 = vld [vmem:[%s4888_s2] sm:$0xff]  ;;  %v182_v1 = vld [vmem:[%s4888_s2 + $0x8] sm:$0xff] }
  0x5b   :  { %v183_v2 = vld [vmem:[%s4888_s2 + $0x10] sm:$0xff]  ;;  %v3561_v3 = vpack.c.bf16 %v182_v1, %v181_v0  ;;  %v184_v4 = vld [vmem:[%s4888_s2 + $0x18] sm:$0xff]  ;;  %v185_v6 = vld [vmem:[%s4888_s2 + $0x20] sm:$0xff] }
  0x5c   :  { %v3565_v5 = vpack.c.bf16 %v184_v4, %v183_v2  ;;  %v186_v7 = vld [vmem:[%s4888_s2 + $0x28] sm:$0xff]  ;;  %v4316_v9 = vld [vmem:[#allocation5] sm:$0xff]   ;;  %v187_v10 = vld [vmem:[%s4888_s2 + $0x30] sm:$0xff] }
  0x5d   :  { %3594 = vmatprep.subr.bf16.mxu1 %v3561_v3  ;;  %3562 = vmatprep.subr.bf16.mxu0 %v3561_v3  ;;  %v3569_v8 = vpack.c.bf16 %v186_v7, %v185_v6  ;;  %v188_v11 = vld [vmem:[%s4888_s2 + $0x38] sm:$0xff]  ;;  %v2461_v12 = vunpack.c.l.bf16 %v4316_v9  ;;  %v2428_v13 = vld [vmem:[#allocation2] sm:$0xff]   ;;  %v190_v16 = vld [vmem:[%s4888_s2 + $0x48] sm:$0xff]  ;;  %v4910_v38 = vunpack.c.h.bf16 %v4316_v9 }
  0x5e   :  { %3596 = vmatpush3.bf16.msra.mxu1 %v3561_v3  ;;  %3564 = vmatpush3.bf16.msra.mxu0 %v3561_v3  ;;  %v3573_v14 = vpack.c.bf16 %v188_v11, %v187_v10  ;;  %v189_v15 = vld [vmem:[%s4888_s2 + $0x40] sm:$0xff]  ;;  %v4333_v17 = vunpack.c.l.bf16 %v2428_v13  ;;  %v191_v19 = vld [vmem:[%s4888_s2 + $0x50] sm:$0xff]  ;;  %v192_v20 = vld [vmem:[%s4888_s2 + $0x58] sm:$0xff]  ;;  %v4343_v21 = vunpack.c.h.bf16 %v2428_v13 }
  0x5f   :  { %3598 = vmatprep.subr.bf16.mxu1 %v3565_v5  ;;  %3566 = vmatprep.subr.bf16.mxu0 %v3565_v5  ;;  %v3577_v18 = vpack.c.bf16 %v190_v16, %v189_v15  ;;  %v3581_v22 = vpack.c.bf16 %v192_v20, %v191_v19  ;;  %v2491_v23 = vld [vmem:[#allocation2 + $0x8] sm:$0xff]   ;;  %v193_v24 = vld [vmem:[%s4888_s2 + $0x60] sm:$0xff]  ;;  %v195_v28 = vld [vmem:[%s4888_s2 + $0x70] sm:$0xff] }
  0x60   :  { %2977 = vmatprep.mubr.f32.mxu1 %v2461_v12  ;;  %2921 = vmatprep.mubr.f32.mxu0 %v4333_v17  ;;  %v194_v25 = vld [vmem:[%s4888_s2 + $0x68] sm:$0xff]  ;;  %v4352_v26 = vunpack.c.l.bf16 %v2491_v23  ;;  %v196_v29 = vld [vmem:[%s4888_s2 + $0x78] sm:$0xff]  ;;  %v4361_v30 = vunpack.c.h.bf16 %v2491_v23  ;;  %v2492_v32 = vld [vmem:[#allocation2 + $0x10] sm:$0xff]  }
  0x61   :  { %848 = vxpose.xlu0.b32.start [1/16] %v4333_v17, 128  ;;  %v3585_v27 = vpack.c.bf16 %v194_v25, %v193_v24  ;;  %v3589_v31 = vpack.c.bf16 %v196_v29, %v195_v28  ;;  %v503_v33 = vld [vmem:[#allocation8] sm:$0xff]  ;;  %v504_v34 = vld [vmem:[#allocation8 + $0x8] sm:$0xff]  ;;  %v4364_v35 = vunpack.c.l.bf16 %v2492_v32  ;;  %v505_v39 = vld [vmem:[#allocation8 + $0x10] sm:$0xff]  ;;  %v4371_v42 = vunpack.c.h.bf16 %v2492_v32 }
  0x62   :  { %3600 = vmatpush3.bf16.msra.mxu1 %v3565_v5  ;;  %3568 = vmatpush3.bf16.msra.mxu0 %v3565_v5  ;;  %v4366_v36 = vld [vmem:[#allocation5 + $0x8] sm:$0xff]   ;;  %v3625_v37 = vpack.c.bf16 %v504_v34, %v503_v33  ;;  %v506_v40 = vld [vmem:[#allocation8 + $0x18] sm:$0xff]  ;;  %v4373_v43 = vld [vmem:[#allocation5 + $0x10] sm:$0xff]  }
  0x63   :  { %3602 = vmatprep.subr.bf16.mxu1 %v3569_v8  ;;  %3570 = vmatprep.subr.bf16.mxu0 %v3569_v8  ;;  %v4909_v41 = vunpack.c.l.bf16 %v4366_v36  ;;  %v2493_v44 = vld [vmem:[#allocation2 + $0x18] sm:$0xff]   ;;  %v3629_v45 = vpack.c.bf16 %v506_v40, %v505_v39  ;;  %v4908_v46 = vunpack.c.h.bf16 %v4366_v36  ;;  %v507_v47 = vld [vmem:[#allocation8 + $0x20] sm:$0xff]  ;;  %v508_v48 = vld [vmem:[#allocation8 + $0x28] sm:$0xff]  ;;  %v4907_v49 = vunpack.c.l.bf16 %v4373_v43 }
  0x64   :  { %v4383_v50 = vunpack.c.l.bf16 %v2493_v44  ;;  %v4385_v51 = vld [vmem:[#allocation5 + $0x18] sm:$0xff]   ;;  %v3633_v52 = vpack.c.bf16 %v508_v48, %v507_v47  ;;  %v4906_v53 = vunpack.c.h.bf16 %v4373_v43  ;;  %v509_v54 = vld [vmem:[#allocation8 + $0x30] sm:$0xff]  ;;  %v4396_v57 = vunpack.c.h.bf16 %v2493_v44  ;;  %v4398_v58 = vld [vmem:[#allocation5 + $0x20] sm:$0xff]  }
  0x65   :  { %849 = vxpose.xlu0.b32.cont [2/16] %v4343_v21, 128  ;;  %v510_v55 = vld [vmem:[#allocation8 + $0x38] sm:$0xff]  ;;  %v4905_v56 = vunpack.c.l.bf16 %v4385_v51  ;;  %v2494_v59 = vld [vmem:[#allocation2 + $0x20] sm:$0xff]   ;;  %v4904_v61 = vunpack.c.h.bf16 %v4385_v51  ;;  %v512_v63 = vld [vmem:[#allocation8 + $0x48] sm:$0xff]  ;;  %v4903_v0 = vunpack.c.l.bf16 %v4398_v58  ;;  %v4902_v5 = vunpack.c.h.bf16 %v4398_v58 }
  0x66   :  { %3604 = vmatpush3.bf16.msra.mxu1 %v3569_v8  ;;  %3572 = vmatpush3.bf16.msra.mxu0 %v3569_v8  ;;  %v3637_v60 = vpack.c.bf16 %v510_v55, %v509_v54  ;;  %v511_v62 = vld [vmem:[#allocation8 + $0x40] sm:$0xff]  ;;  %v4409_v1 = vunpack.c.l.bf16 %v2494_v59  ;;  %v4411_v2 = vld [vmem:[#allocation5 + $0x28] sm:$0xff]   ;;  %v513_v6 = vld [vmem:[#allocation8 + $0x50] sm:$0xff]  ;;  %v4422_v10 = vunpack.c.h.bf16 %v2494_v59 }
  0x67   :  { %3606 = vmatprep.subr.bf16.mxu1 %v3573_v14  ;;  %3574 = vmatprep.subr.bf16.mxu0 %v3573_v14  ;;  %v2495_v3 = vld [vmem:[#allocation2 + $0x28] sm:$0xff]   ;;  %v3641_v4 = vpack.c.bf16 %v512_v63, %v511_v62  ;;  %v514_v7 = vld [vmem:[#allocation8 + $0x58] sm:$0xff]  ;;  %v4901_v8 = vunpack.c.l.bf16 %v4411_v2  ;;  %v4424_v11 = vld [vmem:[#allocation5 + $0x30] sm:$0xff]   ;;  %v4900_v16 = vunpack.c.h.bf16 %v4411_v2 }
  0x68   :  { %v4427_v13 = vunpack.c.l.bf16 %v2495_v3  ;;  %v3645_v15 = vpack.c.bf16 %v514_v7, %v513_v6  ;;  %v516_v19 = vld [vmem:[#allocation8 + $0x68] sm:$0xff]  ;;  %v4899_v20 = vunpack.c.l.bf16 %v4424_v11  ;;  %v4439_v23 = vld [vmem:[#allocation5 + $0x38] sm:$0xff]   ;;  %v4898_v28 = vunpack.c.h.bf16 %v4424_v11  ;;  %v517_v29 = vld [vmem:[#allocation8 + $0x70] sm:$0xff] }
  0x69   :  { %850 = vxpose.xlu0.b32.cont [3/16] %v4352_v26, 128  ;;  %v2497_v25 = vld [vmem:[#allocation2 + $0x38] sm:$0xff]   ;;  %v4897_v32 = vunpack.c.l.bf16 %v4439_v23  ;;  %v4896_v39 = vunpack.c.h.bf16 %v4439_v23  ;;  %v487_v44 = vld [vmem:[#allocation7] sm:$0xff]  ;;  %v489_v48 = vld [vmem:[#allocation7 + $0x10] sm:$0xff] }
  0x6a   :  { %3608 = vmatpush3.bf16.msra.mxu1 %v3573_v14  ;;  %3576 = vmatpush3.bf16.msra.mxu0 %v3573_v14  ;;  %v2496_v14 = vld [vmem:[#allocation2 + $0x30] sm:$0xff]   ;;  %v4455_v34 = vunpack.c.l.bf16 %v2497_v25  ;;  %v4464_v40 = vunpack.c.h.bf16 %v2497_v25  ;;  %v491_v62 = vld [vmem:[#allocation7 + $0x20] sm:$0xff]  ;;  %v492_v63 = vld [vmem:[#allocation7 + $0x28] sm:$0xff] }
  0x6b   :  { %3610 = vmatprep.subr.bf16.mxu1 %v3577_v18  ;;  %3578 = vmatprep.subr.bf16.mxu0 %v3577_v18  ;;  %v4442_v24 = vunpack.c.l.bf16 %v2496_v14  ;;  %v4452_v33 = vunpack.c.h.bf16 %v2496_v14  ;;  %v3665_v7 = vpack.c.bf16 %v492_v63, %v491_v62  ;;  %v498_v62 = vld [vmem:[#allocation7 + $0x58] sm:$0xff] }
  0x6d   :  { %851 = vxpose.xlu0.b32.cont [4/16] %v4361_v30, 128 }
  0x6e   :  { %3612 = vmatpush3.bf16.msra.mxu1 %v3577_v18  ;;  %3580 = vmatpush3.bf16.msra.mxu0 %v3577_v18  ;;  %v515_v18 = vld [vmem:[#allocation8 + $0x60] sm:$0xff] }
  0x6f   :  { %3614 = vmatprep.subr.bf16.mxu1 %v3581_v22  ;;  %3582 = vmatprep.subr.bf16.mxu0 %v3581_v22 }
  0x71   :  { %852 = vxpose.xlu0.b32.cont [5/16] %v4364_v35, 128 }
  0x72   :  { %3616 = vmatpush3.bf16.msra.mxu1 %v3581_v22  ;;  %3584 = vmatpush3.bf16.msra.mxu0 %v3581_v22  ;;  %v4437_v22 = vunpack.c.h.bf16 %v2495_v3 }
  0x73   :  { %3618 = vmatprep.subr.bf16.mxu1 %v3585_v27  ;;  %3586 = vmatprep.subr.bf16.mxu0 %v3585_v27 }
  0x75   :  { %853 = vxpose.xlu0.b32.cont [6/16] %v4371_v42, 128 }
  0x76   :  { %3620 = vmatpush3.bf16.msra.mxu1 %v3585_v27  ;;  %3588 = vmatpush3.bf16.msra.mxu0 %v3585_v27  ;;  %v3649_v27 = vpack.c.bf16 %v516_v19, %v515_v18  ;;  %v494_v18 = vld [vmem:[#allocation7 + $0x38] sm:$0xff] }
  0x77   :  { %3622 = vmatprep.subr.bf16.mxu1 %v3589_v31  ;;  %3590 = vmatprep.subr.bf16.mxu0 %v3589_v31 }
  0x79   :  { %854 = vxpose.xlu0.b32.cont [7/16] %v4383_v50, 128 }
  0x7a   :  { %3624 = vmatpush3.bf16.msra.mxu1 %v3589_v31  ;;  %3592 = vmatpush3.bf16.msra.mxu0 %v3589_v31  ;;  %v518_v31 = vld [vmem:[#allocation8 + $0x78] sm:$0xff] }
  0x7b   :  { %3626 = vmatprep.subr.bf16.mxu0 %v3625_v37 }
  0x7d   :  { %2978 = vmatmul.mubr.f32.vlgmr.msra.gmra.mrb[0].mxu1 %v4910_v38  ;;  %2922 = vmatmul.mubr.f32.vlgmr.msra.gmra.mrb[0].mxu0 %v4343_v21 }
  0x7e   :  { %2980 = vmatprep.mubr.f32.mxu1 %v4909_v41  ;;  %2924 = vmatprep.mubr.f32.mxu0 %v4352_v26 }
  0x7f   :  { %3628 = vmatpush3.bf16.msra.mxu0 %v3625_v37  ;;  %855 = vxpose.xlu0.b32.cont [8/16] %v4396_v57, 128  ;;  %v3653_v37 = vpack.c.bf16 %v518_v31, %v517_v29 }
  0x80   :  { %3630 = vmatprep.subr.bf16.mxu0 %v3629_v45 }
  0x81   :  { %2981 = vmatmul.mubr.f32.gmra.mrb[2].mxu1 %v4908_v46  ;;  %2925 = vmatmul.mubr.f32.gmra.mrb[2].mxu0 %v4361_v30 }
  0x82   :  { %2983 = vmatprep.mubr.f32.mxu1 %v4907_v49  ;;  %2927 = vmatprep.mubr.f32.mxu0 %v4364_v35 }
  0x83   :  { %3632 = vmatpush3.bf16.msra.mxu0 %v3629_v45  ;;  %856 = vxpose.xlu0.b32.cont [9/16] %v4409_v1, 128  ;;  %v488_v45 = vld [vmem:[#allocation7 + $0x8] sm:$0xff] }
  0x84   :  { %3634 = vmatprep.subr.bf16.mxu0 %v3633_v52  ;;  %v3657_v47 = vpack.c.bf16 %v488_v45, %v487_v44  ;;  %v496_v44 = vld [vmem:[#allocation7 + $0x48] sm:$0xff] }
  0x85   :  { %2984 = vmatmul.mubr.f32.gmra.mrb[4].mxu1 %v4906_v53  ;;  %2928 = vmatmul.mubr.f32.gmra.mrb[4].mxu0 %v4371_v42 }
  0x86   :  { %2986 = vmatprep.mubr.f32.mxu1 %v4905_v56  ;;  %2930 = vmatprep.mubr.f32.mxu0 %v4383_v50 }
  0x87   :  { %3636 = vmatpush3.bf16.msra.mxu0 %v3633_v52  ;;  %857 = vxpose.xlu0.b32.cont [10/16] %v4422_v10, 128  ;;  %v490_v52 = vld [vmem:[#allocation7 + $0x18] sm:$0xff] }
  0x88   :  { %3638 = vmatprep.subr.bf16.mxu0 %v3637_v60  ;;  %v3661_v59 = vpack.c.bf16 %v490_v52, %v489_v48 }
  0x89   :  { %2987 = vmatmul.mubr.f32.gmra.mrb[6].mxu1 %v4904_v61  ;;  %2931 = vmatmul.mubr.f32.gmra.mrb[6].mxu0 %v4396_v57 }
  0x8a   :  { %2989 = vmatprep.mubr.f32.mxu1 %v4903_v0  ;;  %2933 = vmatprep.mubr.f32.mxu0 %v4409_v1 }
  0x8b   :  { %3640 = vmatpush3.bf16.msra.mxu0 %v3637_v60  ;;  %858 = vxpose.xlu0.b32.cont [11/16] %v4427_v13, 128 }
  0x8c   :  { %3642 = vmatprep.subr.bf16.mxu0 %v3641_v4 }
  0x8d   :  { %2990 = vmatmul.mubr.f32.gmra.mrb[8].mxu1 %v4902_v5  ;;  %2934 = vmatmul.mubr.f32.gmra.mrb[8].mxu0 %v4422_v10 }
  0x8e   :  { %2992 = vmatprep.mubr.f32.mxu1 %v4901_v8  ;;  %2936 = vmatprep.mubr.f32.mxu0 %v4427_v13 }
  0x8f   :  { %3644 = vmatpush3.bf16.msra.mxu0 %v3641_v4  ;;  %859 = vxpose.xlu0.b32.cont [12/16] %v4437_v22, 128 }
  0x90   :  { %3646 = vmatprep.subr.bf16.mxu0 %v3645_v15 }
  0x91   :  { %2993 = vmatmul.mubr.f32.gmra.mrb[10].mxu1 %v4900_v16  ;;  %2937 = vmatmul.mubr.f32.gmra.mrb[10].mxu0 %v4437_v22 }
  0x92   :  { %2995 = vmatprep.mubr.f32.mxu1 %v4899_v20  ;;  %2939 = vmatprep.mubr.f32.mxu0 %v4442_v24 }
  0x93   :  { %3648 = vmatpush3.bf16.msra.mxu0 %v3645_v15  ;;  %860 = vxpose.xlu0.b32.cont [13/16] %v4442_v24, 128  ;;  %v493_v15 = vld [vmem:[#allocation7 + $0x30] sm:$0xff] }
  0x94   :  { %3650 = vmatprep.subr.bf16.mxu0 %v3649_v27  ;;  %v3669_v29 = vpack.c.bf16 %v494_v18, %v493_v15  ;;  %v499_v18 = vld [vmem:[#allocation7 + $0x60] sm:$0xff] }
  0x95   :  { %2996 = vmatmul.mubr.f32.gmra.mrb[12].mxu1 %v4898_v28  ;;  %2940 = vmatmul.mubr.f32.gmra.mrb[12].mxu0 %v4452_v33 }
  0x96   :  { %2998 = vmatprep.mubr.f32.mxu1 %v4897_v32  ;;  %2942 = vmatprep.mubr.f32.mxu0 %v4455_v34 }
  0x97   :  { %3652 = vmatpush3.bf16.msra.mxu0 %v3649_v27  ;;  %861 = vxpose.xlu0.b32.cont [14/16] %v4452_v33, 128 }
  0x98   :  { %3654 = vmatprep.subr.bf16.mxu0 %v3653_v37 }
  0x99   :  { %2999 = vmatmul.mubr.f32.gmra.mrb[14].mxu1 %v4896_v39  ;;  %2943 = vmatmul.mubr.f32.gmra.mrb[14].mxu0 %v4464_v40  ;;  %v501_v39 = vld [vmem:[#allocation7 + $0x70] sm:$0xff] }
  0x9b   :  { %3656 = vmatpush3.bf16.msra.mxu0 %v3653_v37  ;;  %862 = vxpose.xlu0.b32.cont [15/16] %v4455_v34, 128  ;;  %v495_v37 = vld [vmem:[#allocation7 + $0x40] sm:$0xff] }
  0x9c   :  { %3658 = vmatprep.subr.bf16.mxu0 %v3657_v47  ;;  %v3673_v52 = vpack.c.bf16 %v496_v44, %v495_v37 }
  0x9f   :  { %863 = vxpose.xlu0.b32.end [16/16] %v4464_v40, 128 }
 0x150   :  { %v2979_v54 = vpop.f32.mrb[0].mxu1  ;;  %v4474_v60 = vpop.f32.mrb[0].mxu0 }
 0x151   :  { %v408_v55 = vpop.f32.mrb[1].mxu1  ;;  %v4476_v3 = vpop.f32.mrb[1].mxu0 }
 0x152   :  { %3033 = vmatprep.mubr.f32.mxu0 %v408_v55  ;;  %v497_v55 = vld [vmem:[#allocation7 + $0x50] sm:$0xff] }
 0x153   :  { %3034 = vmatmul.mubr.f32.vlgmr.msra.gmra.mrb[16].mxu0 %v2979_v54 }
 0x154   :  { %v2982_v4 = vpop.f32.mrb[2].mxu1  ;;  %3660 = vmatpush3.bf16.msra.mxu0 %v3657_v47  ;;  %v4478_v14 = vpop.f32.mrb[2].mxu0 }
 0x155   :  { %v418_v6 = vpop.f32.mrb[3].mxu1  ;;  %3662 = vmatprep.subr.bf16.mxu0 %v3661_v59  ;;  %v4480_v19 = vpop.f32.mrb[3].mxu0 }
 0x156   :  { %3036 = vmatprep.mubr.f32.mxu0 %v418_v6  ;;  %v3677_v6 = vpack.c.bf16 %v498_v62, %v497_v55 }
 0x157   :  { %3037 = vmatmul.mubr.f32.gmra.mrb[18].mxu0 %v2982_v4 }
 0x158   :  { %v2985_v25 = vpop.f32.mrb[4].mxu1  ;;  %3664 = vmatpush3.bf16.msra.mxu0 %v3661_v59  ;;  %v2929_v31 = vpop.f32.mrb[4].mxu0 }
 0x159   :  { %v428_v27 = vpop.f32.mrb[5].mxu1  ;;  %3666 = vmatprep.subr.bf16.mxu0 %v3665_v7  ;;  %v283_v45 = vpop.f32.mrb[5].mxu0 }
 0x15a   :  { %3039 = vmatprep.mubr.f32.mxu0 %v428_v27 }
 0x15b   :  { %3040 = vmatmul.mubr.f32.gmra.mrb[20].mxu0 %v2985_v25  ;;  %v500_v25 = vld [vmem:[#allocation7 + $0x68] sm:$0xff] }
 0x15c   :  { %v2988_v47 = vpop.f32.mrb[6].mxu1  ;;  %3668 = vmatpush3.bf16.msra.mxu0 %v3665_v7  ;;  %v2932_v54 = vpop.f32.mrb[6].mxu0  ;;  %v3681_v44 = vpack.c.bf16 %v500_v25, %v499_v18 }
 0x15d   :  { %v438_v48 = vpop.f32.mrb[7].mxu1  ;;  %3670 = vmatprep.subr.bf16.mxu0 %v3669_v29  ;;  %v293_v63 = vpop.f32.mrb[7].mxu0 }
 0x15e   :  { %3042 = vmatprep.mubr.f32.mxu0 %v438_v48 }
 0x15f   :  { %3043 = vmatmul.mubr.f32.gmra.mrb[22].mxu0 %v2988_v47  ;;  %v502_v47 = vld [vmem:[#allocation7 + $0x78] sm:$0xff] }
 0x160   :  { %v2991_v59 = vpop.f32.mrb[8].mxu1  ;;  %3672 = vmatpush3.bf16.msra.mxu0 %v3669_v29  ;;  %v2935_v15 = vpop.f32.mrb[8].mxu0  ;;  %v3685_v62 = vpack.c.bf16 %v502_v47, %v501_v39 }
 0x161   :  { %v448_v4 = vpop.f32.mrb[9].mxu1  ;;  %3674 = vmatprep.subr.bf16.mxu0 %v3673_v52  ;;  %v303_v27 = vpop.f32.mrb[9].mxu0 }
 0x162   :  { %3045 = vmatprep.mubr.f32.mxu0 %v448_v4  ;;  %v4487_v39 = vpop.trf.xlu0 }
 0x163   :  { %3046 = vmatmul.mubr.f32.gmra.mrb[24].mxu0 %v2991_v59  ;;  %3145 = vmatprep.mubr.f32.mxu1 %v4487_v39 }
 0x164   :  { %v2994_v7 = vpop.f32.mrb[10].mxu1  ;;  %3676 = vmatpush3.bf16.msra.mxu0 %v3673_v52  ;;  %v2938_v48 = vpop.f32.mrb[10].mxu0 }
 0x165   :  { %v458_v37 = vpop.f32.mrb[11].mxu1  ;;  %3678 = vmatprep.subr.bf16.mxu0 %v3677_v6  ;;  %v313_v32 = vpop.f32.mrb[11].mxu0 }
 0x166   :  { %3048 = vmatprep.mubr.f32.mxu0 %v458_v37 }
 0x167   :  { %3049 = vmatmul.mubr.f32.gmra.mrb[26].mxu0 %v2994_v7 }
 0x168   :  { %v2997_v29 = vpop.f32.mrb[12].mxu1  ;;  %3680 = vmatpush3.bf16.msra.mxu0 %v3677_v6  ;;  %v2941_v4 = vpop.f32.mrb[12].mxu0 }
 0x169   :  { %v468_v55 = vpop.f32.mrb[13].mxu1  ;;  %3682 = vmatprep.subr.bf16.mxu0 %v3681_v44  ;;  %v323_v28 = vpop.f32.mrb[13].mxu0 }
 0x16a   :  { %3051 = vmatprep.mubr.f32.mxu0 %v468_v55 }
 0x16b   :  { %3052 = vmatmul.mubr.f32.gmra.mrb[28].mxu0 %v2997_v29 }
 0x16c   :  { %v3000_v59 = vpop.f32.mrb[14].mxu1  ;;  %3684 = vmatpush3.bf16.msra.mxu0 %v3681_v44  ;;  %v2944_v18 = vpop.f32.mrb[14].mxu0 }
 0x16d   :  { %v478_v52 = vpop.f32.mrb[15].mxu1  ;;  %3686 = vmatprep.subr.bf16.mxu0 %v3685_v62  ;;  %v333_v25 = vpop.f32.mrb[15].mxu0 }
 0x16e   :  { %3054 = vmatprep.mubr.f32.mxu0 %v478_v52 }
 0x16f   :  { %3055 = vmatmul.mubr.f32.gmra.mrb[30].mxu0 %v3000_v59 }
 0x170   :  { %3688 = vmatpush3.bf16.msra.mxu0 %v3685_v62  ;;  %3089 = vmatprep.mubr.f32.mxu0 %v4476_v3  ;;  %v165_v3 = vld [vmem:[%s4889_s3] sm:$0xff] }
 0x173   :  { %3090 = vmatmul.mubr.f32.vlgmr.msra.gmra.mrb[16].mxu0 %v4474_v60  ;;  %v4171_v60 = vmov 0  }
 0x174   :  { %3092 = vmatprep.mubr.f32.mxu0 %v4480_v19  ;;  %3988 = vset.pattern.permute.xlu1 %v4171_v60 }
 0x175   :  { %3989 = vset.pattern.permute.xlu0 %v4171_v60  ;;  %1044 = vperm.xlu1 %3988, %v165_v3  }
 0x177   :  { %3093 = vmatmul.mubr.f32.gmra.mrb[18].mxu0 %v4478_v14 }
 0x178   :  { %3095 = vmatprep.mubr.f32.mxu0 %v283_v45 }
 0x17b   :  { %3096 = vmatmul.mubr.f32.gmra.mrb[20].mxu0 %v2929_v31 }
 0x17c   :  { %3098 = vmatprep.mubr.f32.mxu0 %v293_v63 }
 0x17f   :  { %3099 = vmatmul.mubr.f32.gmra.mrb[22].mxu0 %v2932_v54 }
 0x180   :  { %3101 = vmatprep.mubr.f32.mxu0 %v303_v27 }
 0x183   :  { %3102 = vmatmul.mubr.f32.gmra.mrb[24].mxu0 %v2935_v15 }
 0x184   :  { %3104 = vmatprep.mubr.f32.mxu0 %v313_v32  ;;  %v4493_v32 = vpop.trf.xlu0 }
 0x187   :  { %3105 = vmatmul.mubr.f32.gmra.mrb[26].mxu0 %v2938_v48 }
 0x188   :  { %3107 = vmatprep.mubr.f32.mxu0 %v323_v28  ;;  %v4495_v28 = vpop.trf.xlu0 }
 0x18b   :  { %3108 = vmatmul.mubr.f32.gmra.mrb[28].mxu0 %v2941_v4 }
 0x18c   :  { %3110 = vmatprep.mubr.f32.mxu0 %v333_v25  ;;  %v4497_v14 = vpop.trf.xlu0 }
 0x18f   :  { %3111 = vmatmul.mubr.f32.gmra.mrb[30].mxu0 %v2944_v18 }
 0x190   :  { %3257 = vmatprep.mubr.f32.mxu0 %v4333_v17  ;;  %v4502_v17 = vld [vmem:[%s4892_s6] ss:$0 sm:$0xff]  ;;  %v4504_v19 = vpop.trf.xlu0 }
 0x194   :  { %v4509_v44 = vpop.trf.xlu0 }
 0x198   :  { %v4514_v60 = vpop.trf.xlu0 }
 0x246   :  { %v3091_v31 = vpop.f32.mrb[16].mxu0 }
 0x247   :  { %v817_v45 = vadd.f32 %v3091_v31, %v4502_v17  ;;  %v730_v54 = vpop.f32.mrb[17].mxu0 }
 0x248   :  { %v816_v63 = vadd.f32 %v4502_v17, %v730_v54 }
 0x249   :  { %v833_v6 = vmax.f32 %v817_v45, 0.0 }
 0x24a   :  { %v832_v15 = vmax.f32 %v816_v63, 0.0  ;;  %v3094_v27 = vpop.f32.mrb[18].mxu0 }
 0x24b   :  { %v819_v7 = vadd.f32 %v3094_v27, %v4502_v17  ;;  %v740_v37 = vpop.f32.mrb[19].mxu0 }
 0x24c   :  { %v3689_v48 = vpack.c.bf16 %v833_v6, %v832_v15  ;;  %v818_v47 = vadd.f32 %v4502_v17, %v740_v37 }
 0x24d   :  { %v835_v29 = vmax.f32 %v819_v7, 0.0 }
 0x24e   :  { %v834_v55 = vmax.f32 %v818_v47, 0.0  ;;  %v3097_v62 = vpop.f32.mrb[20].mxu0  ;;  %3690 = vmatprep.subr.bf16.mxu1 %v3689_v48  ;;  %v4519_v47 = vpop.trf.xlu0 }
 0x24f   :  { %v821_v4 = vadd.f32 %v3097_v62, %v4502_v17  ;;  %v750_v59 = vpop.f32.mrb[21].mxu0  ;;  %3692 = vmatpush3.bf16.msra.mxu1 %v3689_v48 }
 0x250   :  { %v3693_v52 = vpack.c.bf16 %v835_v29, %v834_v55  ;;  %v820_v18 = vadd.f32 %v4502_v17, %v750_v59 }
 0x251   :  { %v837_v25 = vmax.f32 %v821_v4, 0.0 }
 0x252   :  { %v836_v3 = vmax.f32 %v820_v18, 0.0  ;;  %v3100_v31 = vpop.f32.mrb[22].mxu0  ;;  %3694 = vmatprep.subr.bf16.mxu1 %v3693_v52 }
 0x253   :  { %v823_v45 = vadd.f32 %v3100_v31, %v4502_v17  ;;  %v760_v54 = vpop.f32.mrb[23].mxu0  ;;  %3696 = vmatpush3.bf16.msra.mxu1 %v3693_v52 }
 0x254   :  { %v3697_v63 = vpack.c.bf16 %v837_v25, %v836_v3  ;;  %v822_v6 = vadd.f32 %v4502_v17, %v760_v54 }
 0x255   :  { %v839_v15 = vmax.f32 %v823_v45, 0.0  ;;  %v4524_v45 = vpop.trf.xlu0 }
 0x256   :  { %v838_v27 = vmax.f32 %v822_v6, 0.0  ;;  %v3103_v7 = vpop.f32.mrb[24].mxu0  ;;  %3698 = vmatprep.subr.bf16.mxu1 %v3697_v63 }
 0x257   :  { %v825_v37 = vadd.f32 %v3103_v7, %v4502_v17  ;;  %v770_v48 = vpop.f32.mrb[25].mxu0  ;;  %3700 = vmatpush3.bf16.msra.mxu1 %v3697_v63 }
 0x258   :  { %v3701_v29 = vpack.c.bf16 %v839_v15, %v838_v27  ;;  %v824_v55 = vadd.f32 %v4502_v17, %v770_v48 }
 0x259   :  { %v841_v62 = vmax.f32 %v825_v37, 0.0 }
 0x25a   :  { %v840_v4 = vmax.f32 %v824_v55, 0.0  ;;  %v3106_v59 = vpop.f32.mrb[26].mxu0  ;;  %3702 = vmatprep.subr.bf16.mxu1 %v3701_v29 }
 0x25b   :  { %v827_v52 = vadd.f32 %v3106_v59, %v4502_v17  ;;  %v780_v18 = vpop.f32.mrb[27].mxu0  ;;  %3704 = vmatpush3.bf16.msra.mxu1 %v3701_v29 }
 0x25c   :  { %v3705_v25 = vpack.c.bf16 %v841_v62, %v840_v4  ;;  %v826_v3 = vadd.f32 %v4502_v17, %v780_v18  ;;  %v4529_v4 = vpop.trf.xlu0 }
 0x25d   :  { %v843_v31 = vmax.f32 %v827_v52, 0.0  ;;  %4934 = vst [vmem:[#allocation16_spill] sm:$0xff] %v4529_v4 }
 0x25e   :  { %v842_v54 = vmax.f32 %v826_v3, 0.0  ;;  %v3109_v63 = vpop.f32.mrb[28].mxu0  ;;  %3706 = vmatprep.subr.bf16.mxu1 %v3705_v25  ;;  %v1025_v3 = vld [vmem:[#allocation10] sm:$0xff] }
 0x25f   :  { %v829_v6 = vadd.f32 %v3109_v63, %v4502_v17  ;;  %v790_v15 = vpop.f32.mrb[29].mxu0  ;;  %3708 = vmatpush3.bf16.msra.mxu1 %v3705_v25  ;;  %v1026_v63 = vld [vmem:[#allocation10 + $0x8] sm:$0xff] }
 0x260   :  { %v3709_v27 = vpack.c.bf16 %v843_v31, %v842_v54  ;;  %v828_v7 = vadd.f32 %v4502_v17, %v790_v15  ;;  %v3721_v54 = vpack.c.bf16 %v1026_v63, %v1025_v3  ;;  %v1027_v15 = vld [vmem:[#allocation10 + $0x10] sm:$0xff]  ;;  %v1034_v3 = vld [vmem:[#allocation10 + $0x48] sm:$0xff] }
 0x261   :  { %v845_v37 = vmax.f32 %v829_v6, 0.0  ;;  %v4532_v6 = vpop.trf.xlu0 }
 0x262   :  { %v844_v48 = vmax.f32 %v828_v7, 0.0  ;;  %v3112_v55 = vpop.f32.mrb[30].mxu0  ;;  %3710 = vmatprep.subr.bf16.mxu1 %v3709_v27  ;;  %4935 = vst [vmem:[#allocation17_spill] sm:$0xff] %v4532_v6  ;;  %v1028_v7 = vld [vmem:[#allocation10 + $0x18] sm:$0xff] }
 0x263   :  { %v831_v29 = vadd.f32 %v3112_v55, %v4502_v17  ;;  %v800_v62 = vpop.f32.mrb[31].mxu0  ;;  %3712 = vmatpush3.bf16.msra.mxu1 %v3709_v27  ;;  %v3725_v27 = vpack.c.bf16 %v1028_v7, %v1027_v15  ;;  %v1029_v55 = vld [vmem:[#allocation10 + $0x20] sm:$0xff] }
 0x264   :  { %v3713_v59 = vpack.c.bf16 %v845_v37, %v844_v48  ;;  %v830_v52 = vadd.f32 %v4502_v17, %v800_v62  ;;  %v1030_v37 = vld [vmem:[#allocation10 + $0x28] sm:$0xff]  ;;  %v1032_v62 = vld [vmem:[#allocation10 + $0x38] sm:$0xff]  ;;  %v1037_v7 = vld [vmem:[#allocation10 + $0x60] sm:$0xff] }
 0x265   :  { %v847_v18 = vmax.f32 %v831_v29, 0.0  ;;  %v4536_v17 = vpop.trf.xlu0  ;;  %v3729_v48 = vpack.c.bf16 %v1030_v37, %v1029_v55  ;;  %v1031_v29 = vld [vmem:[#allocation10 + $0x30] sm:$0xff] }
 0x266   :  { %v846_v25 = vmax.f32 %v830_v52, 0.0  ;;  %3714 = vmatprep.subr.bf16.mxu1 %v3713_v59  ;;  %4936 = vst [vmem:[#allocation18_spill] sm:$0xff] %v4536_v17 }
 0x267   :  { %3716 = vmatpush3.bf16.msra.mxu1 %v3713_v59  ;;  %v3733_v59 = vpack.c.bf16 %v1032_v62, %v1031_v29  ;;  %v1040_v29 = vld [vmem:[#allocation10 + $0x78] sm:$0xff] }
 0x268   :  { %v3717_v31 = vpack.c.bf16 %v847_v18, %v846_v25  ;;  %v1033_v18 = vld [vmem:[#allocation10 + $0x40] sm:$0xff]  ;;  %v1035_v25 = vld [vmem:[#allocation10 + $0x50] sm:$0xff] }
 0x269   :  { %v4540_v52 = vpop.trf.xlu0  ;;  %v3737_v63 = vpack.c.bf16 %v1034_v3, %v1033_v18  ;;  %v166_v18 = vld [vmem:[%s4889_s3 + $0x8] sm:$0xff]  ;;  %v167_v3 = vld [vmem:[%s4889_s3 + $0x10] sm:$0xff] }
 0x26a   :  { %3718 = vmatprep.subr.bf16.mxu1 %v3717_v31  ;;  %4937 = vst [vmem:[#allocation19_spill] sm:$0xff] %v4540_v52  ;;  %1049 = vperm.xlu1 %3988, %v166_v18   ;;  %v178_v18 = vld [vmem:[%s4889_s3 + $0x68] sm:$0xff] }
 0x26b   :  { %3720 = vmatpush3.bf16.msra.mxu1 %v3717_v31  ;;  %v1036_v31 = vld [vmem:[#allocation10 + $0x58] sm:$0xff] }
 0x26c   :  { %3722 = vmatprep.subr.bf16.mxu1 %v3721_v54  ;;  %v3741_v15 = vpack.c.bf16 %v1036_v31, %v1035_v25  ;;  %v169_v25 = vld [vmem:[%s4889_s3 + $0x20] sm:$0xff]  ;;  %v170_v31 = vld [vmem:[%s4889_s3 + $0x28] sm:$0xff] }
 0x26e   :  { %3146 = vmatmul.mubr.f32.vlgmr.msra.gmra.mrb[16].mxu1 %v4493_v32  ;;  %1054 = vperm.xlu1 %3988, %v167_v3   ;;  %v179_v3 = vld [vmem:[%s4889_s3 + $0x70] sm:$0xff] }
 0x26f   :  { %3148 = vmatprep.mubr.f32.mxu1 %v4495_v28  ;;  %3724 = vmatpush3.bf16.msra.mxu1 %v3721_v54  ;;  %v4546_v54 = vpop.trf.xlu0 }
 0x270   :  { %3726 = vmatprep.subr.bf16.mxu1 %v3725_v27  ;;  %4938 = vst [vmem:[#allocation20_spill] sm:$0xff] %v4546_v54 }
 0x272   :  { %3149 = vmatmul.mubr.f32.gmra.mrb[18].mxu1 %v4497_v14 }
 0x273   :  { %3151 = vmatprep.mubr.f32.mxu1 %v4504_v19  ;;  %3728 = vmatpush3.bf16.msra.mxu1 %v3725_v27  ;;  %v1038_v27 = vld [vmem:[#allocation10 + $0x68] sm:$0xff]  ;;  %v4550_v37 = vpop.trf.xlu0 }
 0x274   :  { %3730 = vmatprep.subr.bf16.mxu1 %v3729_v48  ;;  %v3745_v55 = vpack.c.bf16 %v1038_v27, %v1037_v7  ;;  %4939 = vst [vmem:[#allocation21_spill] sm:$0xff] %v4550_v37  ;;  %v172_v7 = vld [vmem:[%s4889_s3 + $0x38] sm:$0xff]  ;;  %v173_v27 = vld [vmem:[%s4889_s3 + $0x40] sm:$0xff] }
 0x276   :  { %3152 = vmatmul.mubr.f32.gmra.mrb[20].mxu1 %v4509_v44 }
 0x277   :  { %3154 = vmatprep.mubr.f32.mxu1 %v4514_v60  ;;  %3732 = vmatpush3.bf16.msra.mxu1 %v3729_v48  ;;  %v1039_v48 = vld [vmem:[#allocation10 + $0x70] sm:$0xff] }
 0x278   :  { %3734 = vmatprep.subr.bf16.mxu1 %v3733_v59  ;;  %v3749_v62 = vpack.c.bf16 %v1040_v29, %v1039_v48  ;;  %v175_v48 = vld [vmem:[%s4889_s3 + $0x50] sm:$0xff]  ;;  %v176_v29 = vld [vmem:[%s4889_s3 + $0x58] sm:$0xff] }
 0x27a   :  { %3155 = vmatmul.mubr.f32.gmra.mrb[22].mxu1 %v4519_v47 }
 0x27b   :  { %3157 = vmatprep.mubr.f32.mxu1 %v4524_v45  ;;  %3736 = vmatpush3.bf16.msra.mxu1 %v3733_v59  ;;  %v4555_v59 = vpop.trf.xlu0 }
 0x27c   :  { %3738 = vmatprep.subr.bf16.mxu1 %v3737_v63  ;;  %4940 = vst [vmem:[#allocation22_spill] sm:$0xff] %v4555_v59 }
 0x27e   :  { %3158 = vmatmul.mubr.f32.gmra.mrb[24].mxu1 %v4529_v4 }
 0x27f   :  { %3160 = vmatprep.mubr.f32.mxu1 %v4532_v6  ;;  %3740 = vmatpush3.bf16.msra.mxu1 %v3737_v63  ;;  %v168_v63 = vld [vmem:[%s4889_s3 + $0x18] sm:$0xff] }
 0x280   :  { %3742 = vmatprep.subr.bf16.mxu1 %v3741_v15  ;;  %1059 = vperm.xlu1 %3988, %v168_v63   ;;  %v180_v63 = vld [vmem:[%s4889_s3 + $0x78] sm:$0xff] }
 0x282   :  { %3161 = vmatmul.mubr.f32.gmra.mrb[26].mxu1 %v4536_v17 }
 0x283   :  { %3163 = vmatprep.mubr.f32.mxu1 %v4540_v52  ;;  %3744 = vmatpush3.bf16.msra.mxu1 %v3741_v15  ;;  %v171_v15 = vld [vmem:[%s4889_s3 + $0x30] sm:$0xff] }
 0x284   :  { %3746 = vmatprep.subr.bf16.mxu1 %v3745_v55  ;;  %1064 = vperm.xlu1 %3988, %v169_v25  }
 0x286   :  { %3164 = vmatmul.mubr.f32.gmra.mrb[28].mxu1 %v4546_v54 }
 0x287   :  { %3166 = vmatprep.mubr.f32.mxu1 %v4550_v37  ;;  %3748 = vmatpush3.bf16.msra.mxu1 %v3745_v55  ;;  %v174_v55 = vld [vmem:[%s4889_s3 + $0x48] sm:$0xff] }
 0x288   :  { %3750 = vmatprep.subr.bf16.mxu1 %v3749_v62  ;;  %1069 = vperm.xlu1 %3988, %v170_v31  }
 0x28a   :  { %3167 = vmatmul.mubr.f32.gmra.mrb[30].mxu1 %v4555_v59 }
 0x28b   :  { %3752 = vmatpush3.bf16.msra.mxu1 %v3749_v62  ;;  %v177_v62 = vld [vmem:[%s4889_s3 + $0x60] sm:$0xff] }
 0x28c   :  { %1074 = vperm.xlu1 %3988, %v171_v15  }
 0x290   :  { %1079 = vperm.xlu1 %3988, %v172_v7  }
 0x294   :  { %1084 = vperm.xlu1 %3988, %v173_v27  }
 0x298   :  { %1089 = vperm.xlu1 %3988, %v174_v55  }
 0x29c   :  { %1094 = vperm.xlu1 %3988, %v175_v48  }
 0x2a0   :  { %1099 = vperm.xlu1 %3988, %v176_v29  }
 0x2a4   :  { %1104 = vperm.xlu1 %3988, %v177_v62  }
 0x2a8   :  { %1109 = vperm.xlu1 %3988, %v178_v18  }
 0x2ac   :  { %1114 = vperm.xlu1 %3988, %v179_v3  }
 0x2b0   :  { %1119 = vperm.xlu1 %3988, %v180_v63  }
 0x341   :  { %v3147_v25 = vpop.f32.mrb[16].mxu1 }
 0x342   :  { %v946_v31 = vpop.f32.mrb[17].mxu1 }
 0x343   :  { %3201 = vmatprep.mubr.f32.mxu1 %v946_v31 }
 0x344   :  { %3202 = vmatmul.mubr.f32.vlgmr.msra.gmra.mrb[32].mxu1 %v3147_v25 }
 0x345   :  { %v3150_v15 = vpop.f32.mrb[18].mxu1 }
 0x346   :  { %v956_v7 = vpop.f32.mrb[19].mxu1 }
 0x347   :  { %3204 = vmatprep.mubr.f32.mxu1 %v956_v7 }
 0x348   :  { %3205 = vmatmul.mubr.f32.gmra.mrb[34].mxu1 %v3150_v15 }
 0x349   :  { %v3153_v27 = vpop.f32.mrb[20].mxu1 }
 0x34a   :  { %v966_v55 = vpop.f32.mrb[21].mxu1 }
 0x34b   :  { %3207 = vmatprep.mubr.f32.mxu1 %v966_v55 }
 0x34c   :  { %3208 = vmatmul.mubr.f32.gmra.mrb[36].mxu1 %v3153_v27  ;;  %v4606_v27 = vpop.permute.xlu1 %1044 }
 0x34d   :  { %v3156_v48 = vpop.f32.mrb[22].mxu1  ;;  %4941 = vst [vmem:[#allocation23_spill] sm:$0xff] %v4606_v27 }
 0x34e   :  { %v976_v29 = vpop.f32.mrb[23].mxu1 }
 0x34f   :  { %3210 = vmatprep.mubr.f32.mxu1 %v976_v29 }
 0x350   :  { %3211 = vmatmul.mubr.f32.gmra.mrb[38].mxu1 %v3156_v48  ;;  %v4608_v55 = vpop.permute.xlu1 %1049 }
 0x351   :  { %v3159_v62 = vpop.f32.mrb[24].mxu1  ;;  %4942 = vst [vmem:[#allocation24_spill] sm:$0xff] %v4608_v55 }
 0x352   :  { %v986_v18 = vpop.f32.mrb[25].mxu1 }
 0x353   :  { %3213 = vmatprep.mubr.f32.mxu1 %v986_v18 }
 0x354   :  { %3214 = vmatmul.mubr.f32.gmra.mrb[40].mxu1 %v3159_v62  ;;  %v4610_v48 = vpop.permute.xlu1 %1054 }
 0x355   :  { %v3162_v3 = vpop.f32.mrb[26].mxu1  ;;  %4943 = vst [vmem:[#allocation25_spill] sm:$0xff] %v4610_v48 }
 0x356   :  { %v996_v63 = vpop.f32.mrb[27].mxu1 }
 0x357   :  { %3216 = vmatprep.mubr.f32.mxu1 %v996_v63 }
 0x358   :  { %3217 = vmatmul.mubr.f32.gmra.mrb[42].mxu1 %v3162_v3  ;;  %v4612_v29 = vpop.permute.xlu1 %1059 }
 0x359   :  { %v3165_v25 = vpop.f32.mrb[28].mxu1  ;;  %4944 = vst [vmem:[#allocation26_spill] sm:$0xff] %v4612_v29 }
 0x35a   :  { %v1006_v31 = vpop.f32.mrb[29].mxu1 }
 0x35b   :  { %3219 = vmatprep.mubr.f32.mxu1 %v1006_v31 }
 0x35c   :  { %3220 = vmatmul.mubr.f32.gmra.mrb[44].mxu1 %v3165_v25  ;;  %v4614_v62 = vpop.permute.xlu1 %1064 }
 0x35d   :  { %v3168_v15 = vpop.f32.mrb[30].mxu1  ;;  %4945 = vst [vmem:[#allocation27_spill] sm:$0xff] %v4614_v62 }
 0x35e   :  { %v1016_v7 = vpop.f32.mrb[31].mxu1 }
 0x35f   :  { %3222 = vmatprep.mubr.f32.mxu1 %v1016_v7 }
 0x360   :  { %3223 = vmatmul.mubr.f32.gmra.mrb[46].mxu1 %v3168_v15  ;;  %v4616_v18 = vpop.permute.xlu1 %1069  ;;  %v4631_v15 = vld [vmem:[%s4894_s8] ss:$0 sm:$0xff] }
 0x361   :  { %3313 = vmatprep.mubr.f32.mxu1 %v2461_v12  ;;  %4946 = vst [vmem:[#allocation28_spill] sm:$0xff] %v4616_v18  ;;  %v1129_v7 = vmul.f32 %v4631_v15, %v4608_v55  ;;  %v1128_v20 = vmul.f32 %v4631_v15, %v4606_v27  ;;  %v1131_v56 = vmul.f32 %v4631_v15, %v4612_v29 }
 0x362   :  { %v1130_v49 = vmul.f32 %v4631_v15, %v4610_v48 }
 0x364   :  { %v4618_v3 = vpop.permute.xlu1 %1074 }
 0x365   :  { %4947 = vst [vmem:[#allocation29_spill] sm:$0xff] %v4618_v3 }
 0x368   :  { %v4620_v63 = vpop.permute.xlu1 %1079 }
 0x369   :  { %4948 = vst [vmem:[#allocation30_spill] sm:$0xff] %v4620_v63  ;;  %v1135_v29 = vmul.f32 %v4631_v15, %v4620_v63 }
 0x36c   :  { %v4622_v25 = vpop.permute.xlu1 %1084 }
 0x36d   :  { %4949 = vst [vmem:[#allocation31_spill] sm:$0xff] %v4622_v25 }
 0x370   :  { %v4624_v31 = vpop.permute.xlu1 %1089 }
 0x371   :  { %4950 = vst [vmem:[#allocation32_spill] sm:$0xff] %v4624_v31 }
 0x374   :  { %v4626_v12 = vpop.permute.xlu1 %1094 }
 0x375   :  { %4951 = vst [vmem:[#allocation33_spill] sm:$0xff] %v4626_v12 }
 0x378   :  { %v4637_v16 = vpop.permute.xlu1 %1099 }
 0x379   :  { %4952 = vst [vmem:[#allocation34_spill] sm:$0xff] %v4637_v16 }
 0x37c   :  { %v4649_v59 = vpop.permute.xlu1 %1104 }
 0x37d   :  { %4953 = vst [vmem:[#allocation35_spill] sm:$0xff] %v4649_v59 }
 0x417   :  { %v3203_v8 = vpop.f32.mrb[32].mxu1 }
 0x418   :  { %v1216_v5 = vadd.f32 %v3203_v8, %v1129_v7  ;;  %v1210_v0 = vpop.f32.mrb[33].mxu1 }
 0x419   :  { %v1211_v61 = vadd.f32 %v1210_v0, %v1128_v20 }
 0x41a   :  { %v4641_v53 = vmax.f32 %v1216_v5, 0.0  ;;  %v1133_v5 = vmul.f32 %v4631_v15, %v4616_v18 }
 0x41b   :  { %v4645_v46 = vmax.f32 %v1211_v61, 0.0  ;;  %v3206_v41 = vpop.f32.mrb[34].mxu1  ;;  %v1132_v61 = vmul.f32 %v4631_v15, %v4614_v62 }
 0x41c   :  { %v1226_v38 = vadd.f32 %v3206_v41, %v1131_v56  ;;  %v1220_v55 = vpop.f32.mrb[35].mxu1  ;;  %v1306_v27 = vmul.f32 %v4641_v53, %v4641_v53 }
 0x41d   :  { %v1221_v8 = vadd.f32 %v1220_v55, %v1130_v49  ;;  %v1305_v0 = vmul.f32 %v4645_v46, %v4645_v46 }
 0x41e   :  { %v4655_v20 = vmax.f32 %v1226_v38, 0.0  ;;  %1323 = vadd.xlane.f32.xlu1 %v1306_v27  ;;  %v1134_v38 = vmul.f32 %v4631_v15, %v4618_v3  ;;  %v4669_v27 = vpop.permute.xlu1 %1109 }
 0x41f   :  { %v3209_v41 = vpop.f32.mrb[36].mxu1  ;;  %1321 = vadd.xlane.f32.xlu0 %v1305_v0  ;;  %v4659_v56 = vmax.f32 %v1221_v8, 0.0  ;;  %4954 = vst [vmem:[#allocation36_spill] sm:$0xff] %v4669_v27 }
 0x420   :  { %v1236_v7 = vadd.f32 %v3209_v41, %v1133_v5  ;;  %v1230_v48 = vpop.f32.mrb[37].mxu1  ;;  %v1308_v49 = vmul.f32 %v4655_v20, %v4655_v20 }
 0x421   :  { %v1231_v55 = vadd.f32 %v1230_v48, %v1132_v61  ;;  %v1307_v62 = vmul.f32 %v4659_v56, %v4659_v56 }
 0x422   :  { %v4665_v18 = vmax.f32 %v1236_v7, 0.0  ;;  %1327 = vadd.xlane.f32.xlu1 %v1308_v49  ;;  %v1137_v7 = vmul.f32 %v4631_v15, %v4624_v31 }
 0x423   :  { %v3212_v0 = vpop.f32.mrb[38].mxu1  ;;  %v4671_v8 = vmax.f32 %v1231_v55, 0.0  ;;  %v1136_v55 = vmul.f32 %v4631_v15, %v4622_v25 }
 0x424   :  { %v1246_v5 = vadd.f32 %v3212_v0, %v1135_v29  ;;  %v1240_v41 = vpop.f32.mrb[39].mxu1  ;;  %v1310_v48 = vmul.f32 %v4665_v18, %v4665_v18 }
 0x425   :  { %v1241_v61 = vadd.f32 %v1240_v41, %v1134_v38  ;;  %v1309_v37 = vmul.f32 %v4671_v8, %v4671_v8  ;;  %v4689_v41 = vpop.permute.xlu1 %1114 }
 0x426   :  { %v4679_v49 = vmax.f32 %v1246_v5, 0.0  ;;  %1325 = vadd.xlane.f32.xlu1 %v1307_v62  ;;  %1331 = vadd.xlane.f32.xlu0 %v1310_v48  ;;  %4955 = vst [vmem:[#allocation37_spill] sm:$0xff] %v4689_v41  ;;  %v1139_v62 = vmul.f32 %v4631_v15, %v4637_v16 }
 0x427   :  { %v3215_v3 = vpop.f32.mrb[40].mxu1  ;;  %v4683_v29 = vmax.f32 %v1241_v61, 0.0 }
 0x428   :  { %v1256_v0 = vadd.f32 %v3215_v3, %v1137_v7  ;;  %v1250_v63 = vpop.f32.mrb[41].mxu1  ;;  %v1312_v38 = vmul.f32 %v4679_v49, %v4679_v49  ;;  %v1138_v3 = vmul.f32 %v4631_v15, %v4626_v12 }
 0x429   :  { %v1251_v5 = vadd.f32 %v1250_v63, %v1136_v55  ;;  %v1311_v54 = vmul.f32 %v4683_v29, %v4683_v29 }
 0x42a   :  { %v4693_v48 = vmax.f32 %v1256_v0, 0.0  ;;  %1329 = vadd.xlane.f32.xlu1 %v1309_v37  ;;  %1335 = vadd.xlane.f32.xlu0 %v1312_v38  ;;  %v1141_v0 = vmul.f32 %v4631_v15, %v4669_v27  ;;  %v1140_v38 = vmul.f32 %v4631_v15, %v4649_v59 }
 0x42b   :  { %v3218_v61 = vpop.f32.mrb[42].mxu1  ;;  %v4697_v7 = vmax.f32 %v1251_v5, 0.0  ;;  %v4709_v5 = vpop.permute.xlu1 %1119 }
 0x42c   :  { %v1266_v25 = vadd.f32 %v3218_v61, %v1139_v62  ;;  %v1260_v31 = vpop.f32.mrb[43].mxu1  ;;  %v1314_v63 = vmul.f32 %v4693_v48, %v4693_v48  ;;  %4956 = vst [vmem:[#allocation38_spill] sm:$0xff] %v4709_v5 }
 0x42d   :  { %v1261_v55 = vadd.f32 %v1260_v31, %v1138_v3  ;;  %v1313_v31 = vmul.f32 %v4697_v7, %v4697_v7 }
 0x42e   :  { %v4705_v37 = vmax.f32 %v1266_v25, 0.0  ;;  %1333 = vadd.xlane.f32.xlu1 %v1311_v54  ;;  %1339 = vadd.xlane.f32.xlu0 %v1314_v63  ;;  %v1143_v54 = vmul.f32 %v4631_v15, %v4709_v5 }
 0x42f   :  { %v3221_v62 = vpop.f32.mrb[44].mxu1  ;;  %v4711_v61 = vmax.f32 %v1261_v55, 0.0  ;;  %v1142_v55 = vmul.f32 %v4631_v15, %v4689_v41 }
 0x430   :  { %v1276_v12 = vadd.f32 %v3221_v62, %v1141_v0  ;;  %v1270_v16 = vpop.f32.mrb[45].mxu1  ;;  %v1316_v3 = vmul.f32 %v4705_v37, %v4705_v37 }
 0x431   :  { %v1271_v25 = vadd.f32 %v1270_v16, %v1140_v38  ;;  %v1315_v52 = vmul.f32 %v4711_v61, %v4711_v61 }
 0x432   :  { %v4719_v63 = vmax.f32 %v1276_v12, 0.0  ;;  %1337 = vadd.xlane.f32.xlu1 %v1313_v31  ;;  %1343 = vadd.xlane.f32.xlu0 %v1316_v3 }
 0x433   :  { %v3224_v59 = vpop.f32.mrb[46].mxu1  ;;  %v4723_v0 = vmax.f32 %v1271_v25, 0.0 }
 0x434   :  { %v1286_v62 = vadd.f32 %v3224_v59, %v1143_v54  ;;  %v1280_v27 = vpop.f32.mrb[47].mxu1  ;;  %v1318_v16 = vmul.f32 %v4719_v63, %v4719_v63 }
 0x435   :  { %v1281_v38 = vadd.f32 %v1280_v27, %v1142_v55  ;;  %v1317_v15 = vmul.f32 %v4723_v0, %v4723_v0 }
 0x436   :  { %v4729_v5 = vmax.f32 %v1286_v62, 0.0  ;;  %1341 = vadd.xlane.f32.xlu1 %v1315_v52  ;;  %1347 = vadd.xlane.f32.xlu0 %v1318_v16 }
 0x437   :  { %v4731_v12 = vmax.f32 %v1281_v38, 0.0 }
 0x438   :  { %v1320_v59 = vmul.f32 %v4729_v5, %v4729_v5 }
 0x439   :  { %v1319_v31 = vmul.f32 %v4731_v12, %v4731_v12 }
 0x43a   :  { %1345 = vadd.xlane.f32.xlu1 %v1317_v15  ;;  %1351 = vadd.xlane.f32.xlu0 %v1320_v59 }
 0x43e   :  { %1349 = vadd.xlane.f32.xlu1 %v1319_v31 }
 0x4ab   :  { %v1324_v3 = vpop.xlane.xlu1 %1323 }
 0x4ac   :  { %v1354_v27 = vmax.f32 %v1324_v3, 1e-24  ;;  %v1322_v25 = vpop.xlane.xlu0 %1321 }
 0x4ad   :  { %v1353_v54 = vmax.f32 %v1322_v25, 1e-24 }
 0x4ae   :  { %3990 = vrsqrt.f32 %v1354_v27 }
 0x4af   :  { %3992 = vrsqrt.f32 %v1353_v54  ;;  %v1328_v52 = vpop.xlane.xlu1 %1327 }
 0x4b0   :  { %v1356_v55 = vmax.f32 %v1328_v52, 1e-24 }
 0x4b2   :  { %3994 = vrsqrt.f32 %v1356_v55 }
 0x4b3   :  { %v1326_v62 = vpop.xlane.xlu1 %1325  ;;  %v1332_v16 = vpop.xlane.xlu0 %1331 }
 0x4b4   :  { %v1355_v38 = vmax.f32 %v1326_v62, 1e-24  ;;  %v1358_v41 = vmax.f32 %v1332_v16, 1e-24 }
 0x4b6   :  { %3996 = vrsqrt.f32 %v1355_v38 }
 0x4b7   :  { %v1330_v15 = vpop.xlane.xlu1 %1329  ;;  %v1336_v59 = vpop.xlane.xlu0 %1335  ;;  %3998 = vrsqrt.f32 %v1358_v41 }
 0x4b8   :  { %v3991_v17 = vpop.eup %3990  ;;  %v1357_v6 = vmax.f32 %v1330_v15, 1e-24  ;;  %v1360_v31 = vmax.f32 %v1336_v59, 1e-24 }
 0x4b9   :  { %v3993_v4 = vpop.eup %3992  ;;  %v1386_v3 = vmul.f32 %v3991_v17, %v4641_v53 }
 0x4ba   :  { %4000 = vrsqrt.f32 %v1357_v6  ;;  %v1385_v27 = vmul.f32 %v3993_v4, %v4645_v46 }
 0x4bb   :  { %v1334_v25 = vpop.xlane.xlu1 %1333  ;;  %v1340_v54 = vpop.xlane.xlu0 %1339  ;;  %4002 = vrsqrt.f32 %v1360_v31 }
 0x4bc   :  { %v1359_v52 = vmax.f32 %v1334_v25, 1e-24  ;;  %v1362_v55 = vmax.f32 %v1340_v54, 1e-24  ;;  %v3753_v62 = vpack.c.bf16 %v1386_v3, %v1385_v27  ;;  %v3995_v16 = vpop.eup %3994 }
 0x4bd   :  { %v1388_v4 = vmul.f32 %v3995_v16, %v4655_v20 }
 0x4be   :  { %4004 = vrsqrt.f32 %v1359_v52  ;;  %3754 = vmatprep.subr.bf16.mxu0 %v3753_v62  ;;  %3786 = vmatprep.subr.bf16.mxu1 %v3753_v62 }
 0x4bf   :  { %v1338_v38 = vpop.xlane.xlu1 %1337  ;;  %3756 = vmatpush3.bf16.msra.mxu0 %v3753_v62  ;;  %3788 = vmatpush3.bf16.msra.mxu1 %v3753_v62  ;;  %v1344_v41 = vpop.xlane.xlu0 %1343  ;;  %4006 = vrsqrt.f32 %v1362_v55 }
 0x4c0   :  { %v3997_v15 = vpop.eup %3996  ;;  %v1361_v53 = vmax.f32 %v1338_v38, 1e-24  ;;  %v1364_v6 = vmax.f32 %v1344_v41, 1e-24 }
 0x4c1   :  { %v1387_v46 = vmul.f32 %v3997_v15, %v4659_v56  ;;  %v3999_v17 = vpop.eup %3998 }
 0x4c2   :  { %4008 = vrsqrt.f32 %v1361_v53  ;;  %v1390_v55 = vmul.f32 %v3999_v17, %v4665_v18 }
 0x4c3   :  { %v1342_v59 = vpop.xlane.xlu1 %1341  ;;  %v1348_v31 = vpop.xlane.xlu0 %1347  ;;  %v3757_v3 = vpack.c.bf16 %v1388_v4, %v1387_v46  ;;  %4010 = vrsqrt.f32 %v1364_v6 }
 0x4c4   :  { %v4001_v27 = vpop.eup %4000  ;;  %v1363_v25 = vmax.f32 %v1342_v59, 1e-24  ;;  %v1366_v54 = vmax.f32 %v1348_v31, 1e-24 }
 0x4c5   :  { %3758 = vmatprep.subr.bf16.mxu0 %v3757_v3  ;;  %3790 = vmatprep.subr.bf16.mxu1 %v3757_v3  ;;  %v1389_v52 = vmul.f32 %v4001_v27, %v4671_v8  ;;  %v4003_v62 = vpop.eup %4002 }
 0x4c6   :  { %4012 = vrsqrt.f32 %v1363_v25  ;;  %3760 = vmatpush3.bf16.msra.mxu0 %v3757_v3  ;;  %3792 = vmatpush3.bf16.msra.mxu1 %v3757_v3  ;;  %v1392_v6 = vmul.f32 %v4003_v62, %v4679_v49 }
 0x4c7   :  { %v1346_v20 = vpop.xlane.xlu1 %1345  ;;  %v1352_v56 = vpop.xlane.xlu0 %1351  ;;  %v3761_v16 = vpack.c.bf16 %v1390_v55, %v1389_v52  ;;  %4014 = vrsqrt.f32 %v1366_v54 }
 0x4c8   :  { %v4005_v38 = vpop.eup %4004  ;;  %v1365_v41 = vmax.f32 %v1346_v20, 1e-24  ;;  %v1368_v15 = vmax.f32 %v1352_v56, 1e-24 }
 0x4c9   :  { %3762 = vmatprep.subr.bf16.mxu0 %v3761_v16  ;;  %3794 = vmatprep.subr.bf16.mxu1 %v3761_v16  ;;  %v1391_v53 = vmul.f32 %v4005_v38, %v4683_v29  ;;  %v4007_v8 = vpop.eup %4006 }
 0x4ca   :  { %4016 = vrsqrt.f32 %v1365_v41  ;;  %3764 = vmatpush3.bf16.msra.mxu0 %v3761_v16  ;;  %3796 = vmatpush3.bf16.msra.mxu1 %v3761_v16  ;;  %v1394_v31 = vmul.f32 %v4007_v8, %v4693_v48  ;;  %v1709_v16 = vld [vmem:[#allocation8 + $0x80] sm:$0xff]  ;;  %v1714_v8 = vld [vmem:[#allocation8 + $0xa8] sm:$0xff] }
 0x4cb   :  { %v1350_v18 = vpop.xlane.xlu1 %1349  ;;  %v3765_v46 = vpack.c.bf16 %v1392_v6, %v1391_v53  ;;  %4018 = vrsqrt.f32 %v1368_v15  ;;  %v4957_v6 = vunpack.c.h.bf16 %v4316_v9  ;;  %v1716_v9 = vld [vmem:[#allocation8 + $0xb8] sm:$0xff] }
 0x4cc   :  { %v4009_v4 = vpop.eup %4008  ;;  %v1367_v17 = vmax.f32 %v1350_v18, 1e-24 }
 0x4cd   :  { %3766 = vmatprep.subr.bf16.mxu0 %v3765_v46  ;;  %3798 = vmatprep.subr.bf16.mxu1 %v3765_v46  ;;  %v1393_v59 = vmul.f32 %v4009_v4, %v4697_v7  ;;  %v4011_v3 = vpop.eup %4010  ;;  %v1715_v4 = vld [vmem:[#allocation8 + $0xb0] sm:$0xff] }
 0x4ce   :  { %4020 = vrsqrt.f32 %v1367_v17  ;;  %3768 = vmatpush3.bf16.msra.mxu0 %v3765_v46  ;;  %3800 = vmatpush3.bf16.msra.mxu1 %v3765_v46  ;;  %v1396_v25 = vmul.f32 %v4011_v3, %v4705_v37  ;;  %v4959_v46 = vunpack.c.h.bf16 %v4366_v36  ;;  %v4960_v17 = vunpack.c.l.bf16 %v4373_v43  ;;  %v1719_v3 = vld [vmem:[#allocation8 + $0xd0] sm:$0xff] }
 0x4cf   :  { %v3769_v49 = vpack.c.bf16 %v1394_v31, %v1393_v59  ;;  %v1717_v59 = vld [vmem:[#allocation8 + $0xc0] sm:$0xff]  ;;  %v4962_v31 = vunpack.c.l.bf16 %v4385_v51 }
 0x4d0   :  { %v4013_v29 = vpop.eup %4012 }
 0x4d1   :  { %3770 = vmatprep.subr.bf16.mxu0 %v3769_v49  ;;  %3802 = vmatprep.subr.bf16.mxu1 %v3769_v49  ;;  %v1395_v27 = vmul.f32 %v4013_v29, %v4711_v61  ;;  %v4015_v54 = vpop.eup %4014  ;;  %v1710_v61 = vld [vmem:[#allocation8 + $0x88] sm:$0xff]  ;;  %v1721_v29 = vld [vmem:[#allocation8 + $0xe0] sm:$0xff] }
 0x4d2   :  { %3772 = vmatpush3.bf16.msra.mxu0 %v3769_v49  ;;  %3804 = vmatpush3.bf16.msra.mxu1 %v3769_v49  ;;  %v1398_v7 = vmul.f32 %v4015_v54, %v4719_v63  ;;  %v3817_v15 = vpack.c.bf16 %v1710_v61, %v1709_v16  ;;  %v1711_v63 = vld [vmem:[#allocation8 + $0x90] sm:$0xff]  ;;  %v4964_v49 = vunpack.c.l.bf16 %v4398_v58  ;;  %v4968_v54 = vunpack.c.l.bf16 %v4424_v11 }
 0x4d3   :  { %v3773_v52 = vpack.c.bf16 %v1396_v25, %v1395_v27  ;;  %v4966_v27 = vunpack.c.l.bf16 %v4411_v2  ;;  %v1723_v25 = vld [vmem:[#allocation8 + $0xf0] sm:$0xff] }
 0x4d4   :  { %v4017_v55 = vpop.eup %4016 }
 0x4d5   :  { %3774 = vmatprep.subr.bf16.mxu0 %v3773_v52  ;;  %3806 = vmatprep.subr.bf16.mxu1 %v3773_v52  ;;  %v1397_v48 = vmul.f32 %v4017_v55, %v4723_v0  ;;  %v4019_v62 = vpop.eup %4018  ;;  %v1712_v0 = vld [vmem:[#allocation8 + $0x98] sm:$0xff] }
 0x4d6   :  { %3776 = vmatpush3.bf16.msra.mxu0 %v3773_v52  ;;  %3808 = vmatpush3.bf16.msra.mxu1 %v3773_v52  ;;  %v1400_v38 = vmul.f32 %v4019_v62, %v4729_v5  ;;  %v3821_v53 = vpack.c.bf16 %v1712_v0, %v1711_v63  ;;  %v4958_v5 = vunpack.c.l.bf16 %v4366_v36  ;;  %v1718_v36 = vld [vmem:[#allocation8 + $0xc8] sm:$0xff]  ;;  %v1695_v55 = vld [vmem:[#allocation7 + $0x98] sm:$0xff] }
 0x4d7   :  { %v3777_v20 = vpack.c.bf16 %v1398_v7, %v1397_v48 }
 0x4d8   :  { %v4021_v56 = vpop.eup %4020 }
 0x4d9   :  { %3778 = vmatprep.subr.bf16.mxu0 %v3777_v20  ;;  %3810 = vmatprep.subr.bf16.mxu1 %v3777_v20  ;;  %v1399_v37 = vmul.f32 %v4021_v56, %v4731_v12  ;;  %v1713_v12 = vld [vmem:[#allocation8 + $0xa0] sm:$0xff]  ;;  %v1697_v56 = vld [vmem:[#allocation7 + $0xa8] sm:$0xff] }
 0x4da   :  { %3780 = vmatpush3.bf16.msra.mxu0 %v3777_v20  ;;  %3812 = vmatpush3.bf16.msra.mxu1 %v3777_v20  ;;  %v3825_v18 = vpack.c.bf16 %v1714_v8, %v1713_v12  ;;  %v1700_v12 = vld [vmem:[#allocation7 + $0xc0] sm:$0xff]  ;;  %v1701_v8 = vld [vmem:[#allocation7 + $0xc8] sm:$0xff] }
 0x4db   :  { %v3781_v41 = vpack.c.bf16 %v1400_v38, %v1399_v37  ;;  %v1698_v38 = vld [vmem:[#allocation7 + $0xb0] sm:$0xff] }
 0x4dd   :  { %3782 = vmatprep.subr.bf16.mxu0 %v3781_v41  ;;  %3814 = vmatprep.subr.bf16.mxu1 %v3781_v41 }
 0x4de   :  { %3784 = vmatpush3.bf16.msra.mxu0 %v3781_v41  ;;  %3816 = vmatpush3.bf16.msra.mxu1 %v3781_v41  ;;  %v1699_v41 = vld [vmem:[#allocation7 + $0xb8] sm:$0xff] }
 0x4df   :  { %3818 = vmatprep.subr.bf16.mxu0 %v3817_v15 }
 0x4e1   :  { %3314 = vmatmul.mubr.f32.vlgmr.msra.gmra.mrb[48].mxu1 %v4957_v6  ;;  %3258 = vmatmul.mubr.f32.vlgmr.msra.gmra.mrb[32].mxu0 %v4343_v21  ;;  %v3829_v21 = vpack.c.bf16 %v1716_v9, %v1715_v4  ;;  %v3865_v4 = vpack.c.bf16 %v1701_v8, %v1700_v12 }
 0x4e2   :  { %3316 = vmatprep.mubr.f32.mxu1 %v4958_v5  ;;  %3260 = vmatprep.mubr.f32.mxu0 %v4352_v26  ;;  %v4961_v26 = vunpack.c.h.bf16 %v4373_v43  ;;  %v1720_v43 = vld [vmem:[#allocation8 + $0xd8] sm:$0xff] }
 0x4e3   :  { %3820 = vmatpush3.bf16.msra.mxu0 %v3817_v15 }
 0x4e4   :  { %3822 = vmatprep.subr.bf16.mxu0 %v3821_v53 }
 0x4e5   :  { %3317 = vmatmul.mubr.f32.gmra.mrb[50].mxu1 %v4959_v46  ;;  %3261 = vmatmul.mubr.f32.gmra.mrb[34].mxu0 %v4361_v30  ;;  %v3833_v30 = vpack.c.bf16 %v1718_v36, %v1717_v59 }
 0x4e6   :  { %3319 = vmatprep.mubr.f32.mxu1 %v4960_v17  ;;  %3263 = vmatprep.mubr.f32.mxu0 %v4364_v35  ;;  %v4963_v35 = vunpack.c.h.bf16 %v4385_v51  ;;  %v1722_v51 = vld [vmem:[#allocation8 + $0xe8] sm:$0xff]  ;;  %v1702_v17 = vld [vmem:[#allocation7 + $0xd0] sm:$0xff] }
 0x4e7   :  { %3824 = vmatpush3.bf16.msra.mxu0 %v3821_v53  ;;  %v3861_v53 = vpack.c.bf16 %v1699_v41, %v1698_v38 }
 0x4e8   :  { %3826 = vmatprep.subr.bf16.mxu0 %v3825_v18 }
 0x4e9   :  { %3320 = vmatmul.mubr.f32.gmra.mrb[52].mxu1 %v4961_v26  ;;  %3264 = vmatmul.mubr.f32.gmra.mrb[36].mxu0 %v4371_v42  ;;  %v3837_v42 = vpack.c.bf16 %v1720_v43, %v1719_v3  ;;  %v1705_v3 = vld [vmem:[#allocation7 + $0xe8] sm:$0xff] }
 0x4ea   :  { %3322 = vmatprep.mubr.f32.mxu1 %v4962_v31  ;;  %3266 = vmatprep.mubr.f32.mxu0 %v4383_v50  ;;  %v4965_v50 = vunpack.c.h.bf16 %v4398_v58  ;;  %v1724_v58 = vld [vmem:[#allocation8 + $0xf8] sm:$0xff] }
 0x4eb   :  { %3828 = vmatpush3.bf16.msra.mxu0 %v3825_v18 }
 0x4ec   :  { %3830 = vmatprep.subr.bf16.mxu0 %v3829_v21 }
 0x4ed   :  { %3323 = vmatmul.mubr.f32.gmra.mrb[54].mxu1 %v4963_v35  ;;  %3267 = vmatmul.mubr.f32.gmra.mrb[38].mxu0 %v4396_v57  ;;  %v3841_v57 = vpack.c.bf16 %v1722_v51, %v1721_v29  ;;  %v1704_v35 = vld [vmem:[#allocation7 + $0xe0] sm:$0xff]  ;;  %v1706_v51 = vld [vmem:[#allocation7 + $0xf0] sm:$0xff] }
 0x4ee   :  { %3325 = vmatprep.mubr.f32.mxu1 %v4964_v49  ;;  %3269 = vmatprep.mubr.f32.mxu0 %v4409_v1  ;;  %v4967_v1 = vunpack.c.h.bf16 %v4411_v2  ;;  %v4970_v2 = vunpack.c.l.bf16 %v4439_v23 }
 0x4ef   :  { %3832 = vmatpush3.bf16.msra.mxu0 %v3829_v21  ;;  %v1703_v21 = vld [vmem:[#allocation7 + $0xd8] sm:$0xff] }
 0x4f0   :  { %3834 = vmatprep.subr.bf16.mxu0 %v3833_v30  ;;  %v3869_v31 = vpack.c.bf16 %v1703_v21, %v1702_v17 }
 0x4f1   :  { %3326 = vmatmul.mubr.f32.gmra.mrb[56].mxu1 %v4965_v50  ;;  %3270 = vmatmul.mubr.f32.gmra.mrb[40].mxu0 %v4422_v10  ;;  %v3845_v10 = vpack.c.bf16 %v1724_v58, %v1723_v25  ;;  %v3873_v50 = vpack.c.bf16 %v1705_v3, %v1704_v35 }
 0x4f2   :  { %3328 = vmatprep.mubr.f32.mxu1 %v4966_v27  ;;  %3272 = vmatprep.mubr.f32.mxu0 %v4427_v13  ;;  %v4969_v13 = vunpack.c.h.bf16 %v4424_v11  ;;  %v1693_v11 = vld [vmem:[#allocation7 + $0x88] sm:$0xff]  ;;  %v1707_v27 = vld [vmem:[#allocation7 + $0xf8] sm:$0xff] }
 0x4f3   :  { %3836 = vmatpush3.bf16.msra.mxu0 %v3833_v30  ;;  %v3877_v58 = vpack.c.bf16 %v1707_v27, %v1706_v51 }
 0x4f4   :  { %3838 = vmatprep.subr.bf16.mxu0 %v3837_v42 }
 0x4f5   :  { %3329 = vmatmul.mubr.f32.gmra.mrb[58].mxu1 %v4967_v1  ;;  %3273 = vmatmul.mubr.f32.gmra.mrb[42].mxu0 %v4437_v22  ;;  %v4971_v22 = vunpack.c.h.bf16 %v4439_v23  ;;  %v1696_v23 = vld [vmem:[#allocation7 + $0xa0] sm:$0xff] }
 0x4f6   :  { %3331 = vmatprep.mubr.f32.mxu1 %v4968_v54  ;;  %3275 = vmatprep.mubr.f32.mxu0 %v4442_v24  ;;  %v1692_v24 = vld [vmem:[#allocation7 + $0x80] sm:$0xff]  ;;  %v3857_v61 = vpack.c.bf16 %v1697_v56, %v1696_v23 }
 0x4f7   :  { %3840 = vmatpush3.bf16.msra.mxu0 %v3837_v42  ;;  %v3849_v52 = vpack.c.bf16 %v1693_v11, %v1692_v24  ;;  %v4819_v24 = vld [vmem:[%s4892_s6 + $0x1] ss:$0 sm:$0xff] }
 0x4f8   :  { %3842 = vmatprep.subr.bf16.mxu0 %v3841_v57 }
 0x4f9   :  { %3332 = vmatmul.mubr.f32.gmra.mrb[60].mxu1 %v4969_v13  ;;  %3276 = vmatmul.mubr.f32.gmra.mrb[44].mxu0 %v4452_v33  ;;  %v1694_v33 = vld [vmem:[#allocation7 + $0x90] sm:$0xff] }
 0x4fa   :  { %3334 = vmatprep.mubr.f32.mxu1 %v4970_v2  ;;  %3278 = vmatprep.mubr.f32.mxu0 %v4455_v34  ;;  %v3853_v62 = vpack.c.bf16 %v1695_v55, %v1694_v33 }
 0x4fb   :  { %3844 = vmatpush3.bf16.msra.mxu0 %v3841_v57 }
 0x4fc   :  { %3846 = vmatprep.subr.bf16.mxu0 %v3845_v10 }
 0x4fd   :  { %3335 = vmatmul.mubr.f32.gmra.mrb[62].mxu1 %v4971_v22  ;;  %3279 = vmatmul.mubr.f32.gmra.mrb[46].mxu0 %v4464_v40 }
 0x4fe   :  { %3481 = vmatprep.mubr.f32.mxu1 %v4487_v39 }
 0x4ff   :  { %3848 = vmatpush3.bf16.msra.mxu0 %v3845_v10 }
 0x500   :  { %3850 = vmatprep.subr.bf16.mxu0 %v3849_v52 }
 0x5b4   :  { %v3315_v48 = vpop.f32.mrb[48].mxu1  ;;  %v4801_v7 = vpop.f32.mrb[32].mxu0 }
 0x5b5   :  { %v1612_v34 = vpop.f32.mrb[49].mxu1  ;;  %v4803_v20 = vpop.f32.mrb[33].mxu0 }
 0x5b6   :  { %3369 = vmatprep.mubr.f32.mxu0 %v1612_v34 }
 0x5b7   :  { %3370 = vmatmul.mubr.f32.vlgmr.msra.gmra.mrb[48].mxu0 %v3315_v48 }
 0x5b8   :  { %v3318_v40 = vpop.f32.mrb[50].mxu1  ;;  %3852 = vmatpush3.bf16.msra.mxu0 %v3849_v52  ;;  %v4805_v39 = vpop.f32.mrb[34].mxu0 }
 0x5b9   :  { %v1622_v16 = vpop.f32.mrb[51].mxu1  ;;  %3854 = vmatprep.subr.bf16.mxu0 %v3853_v62  ;;  %v4807_v37 = vpop.f32.mrb[35].mxu0 }
 0x5ba   :  { %3372 = vmatprep.mubr.f32.mxu0 %v1622_v16 }
 0x5bb   :  { %3373 = vmatmul.mubr.f32.gmra.mrb[50].mxu0 %v3318_v40 }
 0x5bc   :  { %v3321_v15 = vpop.f32.mrb[52].mxu1  ;;  %3856 = vmatpush3.bf16.msra.mxu0 %v3853_v62  ;;  %v4809_v63 = vpop.f32.mrb[36].mxu0 }
 0x5bd   :  { %v1632_v0 = vpop.f32.mrb[53].mxu1  ;;  %3858 = vmatprep.subr.bf16.mxu0 %v3857_v61  ;;  %v1487_v6 = vpop.f32.mrb[37].mxu0 }
 0x5be   :  { %3375 = vmatprep.mubr.f32.mxu0 %v1632_v0 }
 0x5bf   :  { %3376 = vmatmul.mubr.f32.gmra.mrb[52].mxu0 %v3321_v15 }
 0x5c0   :  { %v3324_v5 = vpop.f32.mrb[54].mxu1  ;;  %3860 = vmatpush3.bf16.msra.mxu0 %v3857_v61  ;;  %v3268_v18 = vpop.f32.mrb[38].mxu0 }
 0x5c1   :  { %v1642_v46 = vpop.f32.mrb[55].mxu1  ;;  %3862 = vmatprep.subr.bf16.mxu0 %v3861_v53  ;;  %v1497_v9 = vpop.f32.mrb[39].mxu0 }
 0x5c2   :  { %3378 = vmatprep.mubr.f32.mxu0 %v1642_v46 }
 0x5c3   :  { %3379 = vmatmul.mubr.f32.gmra.mrb[54].mxu0 %v3324_v5 }
 0x5c4   :  { %v3327_v26 = vpop.f32.mrb[56].mxu1  ;;  %3864 = vmatpush3.bf16.msra.mxu0 %v3861_v53  ;;  %v3271_v59 = vpop.f32.mrb[40].mxu0 }
 0x5c5   :  { %v1652_v36 = vpop.f32.mrb[57].mxu1  ;;  %3866 = vmatprep.subr.bf16.mxu0 %v3865_v4  ;;  %v1507_v30 = vpop.f32.mrb[41].mxu0 }
 0x5c6   :  { %3381 = vmatprep.mubr.f32.mxu0 %v1652_v36 }
 0x5c7   :  { %3382 = vmatmul.mubr.f32.gmra.mrb[56].mxu0 %v3327_v26 }
 0x5c8   :  { %v3330_v43 = vpop.f32.mrb[58].mxu1  ;;  %3868 = vmatpush3.bf16.msra.mxu0 %v3865_v4  ;;  %v3274_v49 = vpop.f32.mrb[42].mxu0 }
 0x5c9   :  { %v1662_v42 = vpop.f32.mrb[59].mxu1  ;;  %3870 = vmatprep.subr.bf16.mxu0 %v3869_v31  ;;  %v1517_v29 = vpop.f32.mrb[43].mxu0 }
 0x5ca   :  { %3384 = vmatprep.mubr.f32.mxu0 %v1662_v42 }
 0x5cb   :  { %3385 = vmatmul.mubr.f32.gmra.mrb[58].mxu0 %v3330_v43 }
 0x5cc   :  { %v3333_v57 = vpop.f32.mrb[60].mxu1  ;;  %3872 = vmatpush3.bf16.msra.mxu0 %v3869_v31  ;;  %v3277_v1 = vpop.f32.mrb[44].mxu0 }
 0x5cd   :  { %v1672_v25 = vpop.f32.mrb[61].mxu1  ;;  %3874 = vmatprep.subr.bf16.mxu0 %v3873_v50  ;;  %v1527_v54 = vpop.f32.mrb[45].mxu0 }
 0x5ce   :  { %3387 = vmatprep.mubr.f32.mxu0 %v1672_v25 }
 0x5cf   :  { %3388 = vmatmul.mubr.f32.gmra.mrb[60].mxu0 %v3333_v57 }
 0x5d0   :  { %v3336_v10 = vpop.f32.mrb[62].mxu1  ;;  %3876 = vmatpush3.bf16.msra.mxu0 %v3873_v50  ;;  %v3280_v13 = vpop.f32.mrb[46].mxu0 }
 0x5d1   :  { %v1682_v2 = vpop.f32.mrb[63].mxu1  ;;  %3878 = vmatprep.subr.bf16.mxu0 %v3877_v58  ;;  %v1537_v22 = vpop.f32.mrb[47].mxu0 }
 0x5d2   :  { %3390 = vmatprep.mubr.f32.mxu0 %v1682_v2 }
 0x5d3   :  { %3391 = vmatmul.mubr.f32.gmra.mrb[62].mxu0 %v3336_v10 }
 0x5d4   :  { %3880 = vmatpush3.bf16.msra.mxu0 %v3877_v58  ;;  %3425 = vmatprep.mubr.f32.mxu0 %v4803_v20 }
 0x5d7   :  { %3426 = vmatmul.mubr.f32.vlgmr.msra.gmra.mrb[48].mxu0 %v4801_v7 }
 0x5d8   :  { %3428 = vmatprep.mubr.f32.mxu0 %v4807_v37 }
 0x5db   :  { %3429 = vmatmul.mubr.f32.gmra.mrb[50].mxu0 %v4805_v39 }
 0x5dc   :  { %3431 = vmatprep.mubr.f32.mxu0 %v1487_v6 }
 0x5df   :  { %3432 = vmatmul.mubr.f32.gmra.mrb[52].mxu0 %v4809_v63 }
 0x5e0   :  { %3434 = vmatprep.mubr.f32.mxu0 %v1497_v9 }
 0x5e3   :  { %3435 = vmatmul.mubr.f32.gmra.mrb[54].mxu0 %v3268_v18 }
 0x5e4   :  { %3437 = vmatprep.mubr.f32.mxu0 %v1507_v30 }
 0x5e7   :  { %3438 = vmatmul.mubr.f32.gmra.mrb[56].mxu0 %v3271_v59 }
 0x5e8   :  { %3440 = vmatprep.mubr.f32.mxu0 %v1517_v29 }
 0x5eb   :  { %3441 = vmatmul.mubr.f32.gmra.mrb[58].mxu0 %v3274_v49 }
 0x5ec   :  { %3443 = vmatprep.mubr.f32.mxu0 %v1527_v54 }
 0x5ef   :  { %3444 = vmatmul.mubr.f32.gmra.mrb[60].mxu0 %v3277_v1 }
 0x5f0   :  { %3446 = vmatprep.mubr.f32.mxu0 %v1537_v22  ;;  %v2201_v22 = vld [vmem:[#allocation10 + $0x80] sm:$0xff] }
 0x5f3   :  { %3447 = vmatmul.mubr.f32.gmra.mrb[62].mxu0 %v3280_v13 }
 0x6aa   :  { %v3427_v11 = vpop.f32.mrb[48].mxu0 }
 0x6ab   :  { %v2024_v52 = vadd.f32 %v3427_v11, %v4819_v24  ;;  %v1936_v33 = vpop.f32.mrb[49].mxu0  ;;  %v2202_v11 = vld [vmem:[#allocation10 + $0x88] sm:$0xff] }
 0x6ac   :  { %v2023_v55 = vadd.f32 %v4819_v24, %v1936_v33 }
 0x6ad   :  { %v2040_v48 = vmax.f32 %v2024_v52, 0.0 }
 0x6ae   :  { %v2039_v7 = vmax.f32 %v2023_v55, 0.0  ;;  %v3430_v34 = vpop.f32.mrb[50].mxu0  ;;  %v3913_v55 = vpack.c.bf16 %v2202_v11, %v2201_v22 }
 0x6af   :  { %v2026_v62 = vadd.f32 %v3430_v34, %v4819_v24  ;;  %v1946_v20 = vpop.f32.mrb[51].mxu0 }
 0x6b0   :  { %v3881_v23 = vpack.c.bf16 %v2040_v48, %v2039_v7  ;;  %v2025_v56 = vadd.f32 %v4819_v24, %v1946_v20  ;;  %v2203_v48 = vld [vmem:[#allocation10 + $0x90] sm:$0xff]  ;;  %v2204_v7 = vld [vmem:[#allocation10 + $0x98] sm:$0xff]  ;;  %v2206_v20 = vld [vmem:[#allocation10 + $0xa8] sm:$0xff] }
 0x6b1   :  { %v2042_v40 = vmax.f32 %v2026_v62, 0.0  ;;  %v3917_v34 = vpack.c.bf16 %v2204_v7, %v2203_v48  ;;  %v2205_v62 = vld [vmem:[#allocation10 + $0xa0] sm:$0xff] }
 0x6b2   :  { %v2041_v39 = vmax.f32 %v2025_v56, 0.0  ;;  %v3433_v16 = vpop.f32.mrb[52].mxu0  ;;  %3882 = vmatprep.subr.bf16.mxu1 %v3881_v23  ;;  %v2208_v56 = vld [vmem:[#allocation10 + $0xb8] sm:$0xff] }
 0x6b3   :  { %v2028_v61 = vadd.f32 %v3433_v16, %v4819_v24  ;;  %v1956_v37 = vpop.f32.mrb[53].mxu0  ;;  %3884 = vmatpush3.bf16.msra.mxu1 %v3881_v23  ;;  %v2207_v23 = vld [vmem:[#allocation10 + $0xb0] sm:$0xff]  ;;  %v2210_v16 = vld [vmem:[#allocation10 + $0xc8] sm:$0xff] }
 0x6b4   :  { %v3885_v38 = vpack.c.bf16 %v2042_v40, %v2041_v39  ;;  %v2027_v41 = vadd.f32 %v4819_v24, %v1956_v37  ;;  %v3925_v40 = vpack.c.bf16 %v2208_v56, %v2207_v23  ;;  %v2209_v39 = vld [vmem:[#allocation10 + $0xc0] sm:$0xff]  ;;  %v2214_v37 = vld [vmem:[#allocation10 + $0xe8] sm:$0xff] }
 0x6b5   :  { %v2044_v15 = vmax.f32 %v2028_v61, 0.0  ;;  %v2212_v61 = vld [vmem:[#allocation10 + $0xd8] sm:$0xff]  ;;  %v4986_v56 = vld [vmem:[#allocation29_spill] sm:$0xff] }
 0x6b6   :  { %v2043_v63 = vmax.f32 %v2027_v41, 0.0  ;;  %v3436_v0 = vpop.f32.mrb[54].mxu0  ;;  %3886 = vmatprep.subr.bf16.mxu1 %v3885_v38  ;;  %v4973_v41 = vld [vmem:[#allocation17_spill] sm:$0xff] }
 0x6b7   :  { %v2030_v53 = vadd.f32 %v3436_v0, %v4819_v24  ;;  %v1966_v6 = vpop.f32.mrb[55].mxu0  ;;  %3888 = vmatpush3.bf16.msra.mxu1 %v3885_v38  ;;  %v4972_v38 = vld [vmem:[#allocation16_spill] sm:$0xff]  ;;  %v4975_v0 = vld [vmem:[#allocation19_spill] sm:$0xff] }
 0x6b8   :  { %v3889_v12 = vpack.c.bf16 %v2044_v15, %v2043_v63  ;;  %v2029_v8 = vadd.f32 %v4819_v24, %v1966_v6  ;;  %v2216_v15 = vld [vmem:[#allocation10 + $0xf8] sm:$0xff]  ;;  %v4974_v63 = vld [vmem:[#allocation18_spill] sm:$0xff] }
 0x6b9   :  { %v2046_v5 = vmax.f32 %v2030_v53, 0.0  ;;  %v4977_v53 = vld [vmem:[#allocation21_spill] sm:$0xff]  ;;  %v4978_v6 = vld [vmem:[#allocation22_spill] sm:$0xff] }
 0x6ba   :  { %v2045_v18 = vmax.f32 %v2029_v8, 0.0  ;;  %v3439_v46 = vpop.f32.mrb[56].mxu0  ;;  %3890 = vmatprep.subr.bf16.mxu1 %v3889_v12 }
 0x6bb   :  { %v2032_v4 = vadd.f32 %v3439_v46, %v4819_v24  ;;  %v1976_v9 = vpop.f32.mrb[57].mxu0  ;;  %3892 = vmatpush3.bf16.msra.mxu1 %v3889_v12 }
 0x6bc   :  { %v3893_v17 = vpack.c.bf16 %v2046_v5, %v2045_v18  ;;  %v2031_v21 = vadd.f32 %v4819_v24, %v1976_v9 }
 0x6bd   :  { %v2048_v26 = vmax.f32 %v2032_v4, 0.0 }
 0x6be   :  { %v2047_v59 = vmax.f32 %v2031_v21, 0.0  ;;  %v3442_v36 = vpop.f32.mrb[58].mxu0  ;;  %3894 = vmatprep.subr.bf16.mxu1 %v3893_v17 }
 0x6bf   :  { %v2034_v31 = vadd.f32 %v3442_v36, %v4819_v24  ;;  %v1986_v30 = vpop.f32.mrb[59].mxu0  ;;  %3896 = vmatpush3.bf16.msra.mxu1 %v3893_v17 }
 0x6c0   :  { %v3897_v35 = vpack.c.bf16 %v2048_v26, %v2047_v59  ;;  %v2033_v3 = vadd.f32 %v4819_v24, %v1986_v30 }
 0x6c1   :  { %v2050_v43 = vmax.f32 %v2034_v31, 0.0 }
 0x6c2   :  { %v2049_v49 = vmax.f32 %v2033_v3, 0.0  ;;  %v3445_v42 = vpop.f32.mrb[60].mxu0  ;;  %3898 = vmatprep.subr.bf16.mxu1 %v3897_v35 }
 0x6c3   :  { %v2036_v50 = vadd.f32 %v3445_v42, %v4819_v24  ;;  %v1996_v29 = vpop.f32.mrb[61].mxu0  ;;  %3900 = vmatpush3.bf16.msra.mxu1 %v3897_v35 }
 0x6c4   :  { %v3901_v51 = vpack.c.bf16 %v2050_v43, %v2049_v49  ;;  %v2035_v27 = vadd.f32 %v4819_v24, %v1996_v29  ;;  %v2426_v43 = vld [vmem:[%s4894_s8 + $0x1] ss:$0 sm:$0xff]  ;;  %s4172_s8 = smov [#allocation11]  }
 0x6c5   :  { %v2052_v57 = vmax.f32 %v2036_v50, 0.0  ;;  %v4979_v49 = vld [vmem:[#allocation24_spill] sm:$0xff]  ;;  %v4980_v50 = vld [vmem:[#allocation23_spill] sm:$0xff]  ;;  %s2407_s5 = sshll.u32 %s4172_s8, 4  ;;  %s2408_s5 = int_to_ptr.vmem [resolvable:$true] %s2407_s5 }
 0x6c6   :  { %v2051_v1 = vmax.f32 %v2035_v27, 0.0  ;;  %v3448_v25 = vpop.f32.mrb[62].mxu0  ;;  %3902 = vmatprep.subr.bf16.mxu1 %v3901_v51  ;;  %v2226_v42 = vmul.f32 %v2426_v43, %v4979_v49  ;;  %v2225_v29 = vmul.f32 %v2426_v43, %v4980_v50  ;;  %s4132_s24 = scalar_lea.vmem %s2408_s5, 2048  ;;  %p4137_p13 = scmp.lt.s32.totalorder %s2408_s5, %s2408_s5 }
 0x6c7   :  { %v2038_v58 = vadd.f32 %v3448_v25, %v4819_v24  ;;  %v2006_v54 = vpop.f32.mrb[63].mxu0  ;;  %3904 = vmatpush3.bf16.msra.mxu1 %v3901_v51  ;;  %v4981_v25 = vld [vmem:[#allocation26_spill] sm:$0xff]  ;;  %p4133_p12 = scmp.ne.s32.totalorder %s2408_s5, %s4132_s24  ;;  %p4138_p0 = scmp.lt.s32.totalorder %s4132_s24, %s4132_s24 }
 0x6c8   :  { %v3905_v10 = vpack.c.bf16 %v2052_v57, %v2051_v1  ;;  %v2037_v13 = vadd.f32 %v4819_v24, %v2006_v54  ;;  %v3921_v24 = vpack.c.bf16 %v2206_v20, %v2205_v62  ;;  %v4982_v54 = vld [vmem:[#allocation25_spill] sm:$0xff] }
 0x6c9   :  { %v2054_v2 = vmax.f32 %v2038_v58, 0.0  ;;  %v2228_v58 = vmul.f32 %v2426_v43, %v4981_v25  ;;  %p4139_p1 = por %p4138_p0, %p4137_p13 }
 0x6ca   :  { %v2053_v52 = vmax.f32 %v2037_v13, 0.0  ;;  %3906 = vmatprep.subr.bf16.mxu1 %v3905_v10 }
 0x6cb   :  { %3908 = vmatpush3.bf16.msra.mxu1 %v3905_v10  ;;  %v2227_v10 = vmul.f32 %v2426_v43, %v4982_v54  ;;  %p4140_p2 = pnand %p4139_p1, %p4133_p12 }
 0x6cc   :  { %v3909_v33 = vpack.c.bf16 %v2054_v2, %v2053_v52  ;;  %v4983_v52 = vld [vmem:[#allocation28_spill] sm:$0xff] }
 0x6ce   :  { %3910 = vmatprep.subr.bf16.mxu1 %v3909_v33 }
 0x6cf   :  { %3912 = vmatpush3.bf16.msra.mxu1 %v3909_v33  ;;  %v2230_v33 = vmul.f32 %v2426_v43, %v4983_v52 }
 0x6d0   :  { %3914 = vmatprep.subr.bf16.mxu1 %v3913_v55 }
 0x6d2   :  { %3482 = vmatmul.mubr.f32.vlgmr.msra.gmra.mrb[64].mxu1 %v4493_v32  ;;  %v3929_v32 = vpack.c.bf16 %v2210_v16, %v2209_v39 }
 0x6d3   :  { %3484 = vmatprep.mubr.f32.mxu1 %v4495_v28  ;;  %3916 = vmatpush3.bf16.msra.mxu1 %v3913_v55  ;;  %v2211_v28 = vld [vmem:[#allocation10 + $0xd0] sm:$0xff]  ;;  %v4984_v55 = vld [vmem:[#allocation27_spill] sm:$0xff] }
 0x6d4   :  { %3918 = vmatprep.subr.bf16.mxu1 %v3917_v34  ;;  %v2229_v48 = vmul.f32 %v2426_v43, %v4984_v55 }
 0x6d6   :  { %3485 = vmatmul.mubr.f32.gmra.mrb[66].mxu1 %v4497_v14  ;;  %v3933_v14 = vpack.c.bf16 %v2212_v61, %v2211_v28  ;;  %v4987_v61 = vld [vmem:[#allocation32_spill] sm:$0xff] }
 0x6d7   :  { %3487 = vmatprep.mubr.f32.mxu1 %v4504_v19  ;;  %3920 = vmatpush3.bf16.msra.mxu1 %v3917_v34  ;;  %v2213_v19 = vld [vmem:[#allocation10 + $0xe0] sm:$0xff] }
 0x6d8   :  { %3922 = vmatprep.subr.bf16.mxu1 %v3921_v24 }
 0x6da   :  { %3488 = vmatmul.mubr.f32.gmra.mrb[68].mxu1 %v4509_v44  ;;  %v3937_v44 = vpack.c.bf16 %v2214_v37, %v2213_v19  ;;  %v4988_v19 = vld [vmem:[#allocation31_spill] sm:$0xff] }
 0x6db   :  { %3490 = vmatprep.mubr.f32.mxu1 %v4514_v60  ;;  %3924 = vmatpush3.bf16.msra.mxu1 %v3921_v24  ;;  %v2215_v60 = vld [vmem:[#allocation10 + $0xf0] sm:$0xff]  ;;  %v2233_v37 = vmul.f32 %v2426_v43, %v4988_v19 }
 0x6dc   :  { %3926 = vmatprep.subr.bf16.mxu1 %v3925_v40  ;;  %v4985_v24 = vld [vmem:[#allocation30_spill] sm:$0xff] }
 0x6dd   :  { %v2232_v23 = vmul.f32 %v2426_v43, %v4985_v24 }
 0x6de   :  { %3491 = vmatmul.mubr.f32.gmra.mrb[70].mxu1 %v4519_v47  ;;  %v3941_v47 = vpack.c.bf16 %v2216_v15, %v2215_v60  ;;  %v4989_v15 = vld [vmem:[#allocation34_spill] sm:$0xff] }
 0x6df   :  { %3493 = vmatprep.mubr.f32.mxu1 %v4524_v45  ;;  %3928 = vmatpush3.bf16.msra.mxu1 %v3925_v40  ;;  %v4976_v45 = vld [vmem:[#allocation20_spill] sm:$0xff]  ;;  %v2231_v40 = vmul.f32 %v2426_v43, %v4986_v56 }
 0x6e0   :  { %3930 = vmatprep.subr.bf16.mxu1 %v3929_v32 }
 0x6e2   :  { %3494 = vmatmul.mubr.f32.gmra.mrb[72].mxu1 %v4972_v38 }
 0x6e3   :  { %3496 = vmatprep.mubr.f32.mxu1 %v4973_v41  ;;  %3932 = vmatpush3.bf16.msra.mxu1 %v3929_v32 }
 0x6e4   :  { %3934 = vmatprep.subr.bf16.mxu1 %v3933_v14 }
 0x6e6   :  { %3497 = vmatmul.mubr.f32.gmra.mrb[74].mxu1 %v4974_v63  ;;  %v2236_v63 = vmul.f32 %v2426_v43, %v4989_v15 }
 0x6e7   :  { %3499 = vmatprep.mubr.f32.mxu1 %v4975_v0  ;;  %3936 = vmatpush3.bf16.msra.mxu1 %v3933_v14  ;;  %v2234_v14 = vmul.f32 %v2426_v43, %v4987_v61  ;;  %v4990_v0 = vld [vmem:[#allocation33_spill] sm:$0xff] }
 0x6e8   :  { %3938 = vmatprep.subr.bf16.mxu1 %v3937_v44 }
 0x6ea   :  { %3500 = vmatmul.mubr.f32.gmra.mrb[76].mxu1 %v4976_v45 }
 0x6eb   :  { %3502 = vmatprep.mubr.f32.mxu1 %v4977_v53  ;;  %3940 = vmatpush3.bf16.msra.mxu1 %v3937_v44 }
 0x6ec   :  { %3942 = vmatprep.subr.bf16.mxu1 %v3941_v47 }
 0x6ee   :  { %3503 = vmatmul.mubr.f32.gmra.mrb[78].mxu1 %v4978_v6 }
 0x6ef   :  { %3944 = vmatpush3.bf16.msra.mxu1 %v3941_v47  ;;  %v2235_v47 = vmul.f32 %v2426_v43, %v4990_v0 }
 0x7a5   :  { %v3483_v12 = vpop.f32.mrb[64].mxu1 }
 0x7a6   :  { %v2121_v8 = vpop.f32.mrb[65].mxu1 }
 0x7a7   :  { %3537 = vmatprep.mubr.f32.mxu1 %v2121_v8  ;;  %v4991_v8 = vld [vmem:[#allocation36_spill] sm:$0xff] }
 0x7a8   :  { %3538 = vmatmul.mubr.f32.vlgmr.msra.gmra.mrb[80].mxu1 %v3483_v12 }
 0x7a9   :  { %v3486_v5 = vpop.f32.mrb[66].mxu1 }
 0x7aa   :  { %v2131_v18 = vpop.f32.mrb[67].mxu1 }
 0x7ab   :  { %3540 = vmatprep.mubr.f32.mxu1 %v2131_v18  ;;  %v4992_v18 = vld [vmem:[#allocation35_spill] sm:$0xff] }
 0x7ac   :  { %3541 = vmatmul.mubr.f32.gmra.mrb[82].mxu1 %v3486_v5  ;;  %v2238_v5 = vmul.f32 %v2426_v43, %v4991_v8 }
 0x7ad   :  { %v3489_v46 = vpop.f32.mrb[68].mxu1 }
 0x7ae   :  { %v2141_v4 = vpop.f32.mrb[69].mxu1 }
 0x7af   :  { %3543 = vmatprep.mubr.f32.mxu1 %v2141_v4 }
 0x7b0   :  { %3544 = vmatmul.mubr.f32.gmra.mrb[84].mxu1 %v3489_v46  ;;  %v2237_v46 = vmul.f32 %v2426_v43, %v4992_v18 }
 0x7b1   :  { %v3492_v9 = vpop.f32.mrb[70].mxu1 }
 0x7b2   :  { %v2151_v17 = vpop.f32.mrb[71].mxu1 }
 0x7b3   :  { %3546 = vmatprep.mubr.f32.mxu1 %v2151_v17 }
 0x7b4   :  { %3547 = vmatmul.mubr.f32.gmra.mrb[86].mxu1 %v3492_v9 }
 0x7b5   :  { %v3495_v21 = vpop.f32.mrb[72].mxu1 }
 0x7b6   :  { %v2161_v26 = vpop.f32.mrb[73].mxu1 }
 0x7b7   :  { %3549 = vmatprep.mubr.f32.mxu1 %v2161_v26  ;;  %v4993_v26 = vld [vmem:[#allocation38_spill] sm:$0xff] }
 0x7b8   :  { %3550 = vmatmul.mubr.f32.gmra.mrb[88].mxu1 %v3495_v21 }
 0x7b9   :  { %v3498_v59 = vpop.f32.mrb[74].mxu1 }
 0x7ba   :  { %v2171_v36 = vpop.f32.mrb[75].mxu1 }
 0x7bb   :  { %3552 = vmatprep.mubr.f32.mxu1 %v2171_v36  ;;  %v4994_v36 = vld [vmem:[#allocation37_spill] sm:$0xff] }
 0x7bc   :  { %3553 = vmatmul.mubr.f32.gmra.mrb[90].mxu1 %v3498_v59  ;;  %v2240_v59 = vmul.f32 %v2426_v43, %v4993_v26 }
 0x7bd   :  { %v3501_v31 = vpop.f32.mrb[76].mxu1 }
 0x7be   :  { %v2181_v30 = vpop.f32.mrb[77].mxu1 }
 0x7bf   :  { %3555 = vmatprep.mubr.f32.mxu1 %v2181_v30 }
 0x7c0   :  { %3556 = vmatmul.mubr.f32.gmra.mrb[92].mxu1 %v3501_v31  ;;  %v2239_v31 = vmul.f32 %v2426_v43, %v4994_v36 }
 0x7c1   :  { %v3504_v35 = vpop.f32.mrb[78].mxu1 }
 0x7c2   :  { %v2191_v3 = vpop.f32.mrb[79].mxu1 }
 0x7c3   :  { %3558 = vmatprep.mubr.f32.mxu1 %v2191_v3 }
 0x7c4   :  { %3559 = vmatmul.mubr.f32.gmra.mrb[94].mxu1 %v3504_v35 }
 0x87b   :  { %v3539_v51 = vpop.f32.mrb[80].mxu1 }
 0x87c   :  { %v2313_v27 = vadd.f32 %v3539_v51, %v2226_v42  ;;  %v2307_v57 = vpop.f32.mrb[81].mxu1 }
 0x87d   :  { %v2308_v1 = vadd.f32 %v2307_v57, %v2225_v29 }
 0x87e   :  { %2387 = vst [vmem:[#allocation11 + $0x8] sm:$0xff] %v2313_v27 }
 0x87f   :  { %2386 = vst [vmem:[#allocation11] sm:$0xff] %v2308_v1  ;;  %v3542_v13 = vpop.f32.mrb[82].mxu1 }
 0x880   :  { %v2323_v2 = vadd.f32 %v3542_v13, %v2228_v58  ;;  %v2317_v22 = vpop.f32.mrb[83].mxu1 }
 0x881   :  { %v2318_v11 = vadd.f32 %v2317_v22, %v2227_v10 }
 0x882   :  { %2389 = vst [vmem:[#allocation11 + $0x18] sm:$0xff] %v2323_v2 }
 0x883   :  { %2388 = vst [vmem:[#allocation11 + $0x10] sm:$0xff] %v2318_v11  ;;  %v3545_v7 = vpop.f32.mrb[84].mxu1 }
 0x884   :  { %v2333_v34 = vadd.f32 %v3545_v7, %v2230_v33  ;;  %v2327_v62 = vpop.f32.mrb[85].mxu1 }
 0x885   :  { %v2328_v20 = vadd.f32 %v2327_v62, %v2229_v48 }
 0x886   :  { %2391 = vst [vmem:[#allocation11 + $0x28] sm:$0xff] %v2333_v34 }
 0x887   :  { %2390 = vst [vmem:[#allocation11 + $0x20] sm:$0xff] %v2328_v20  ;;  %v3548_v39 = vpop.f32.mrb[86].mxu1 }
 0x888   :  { %v2343_v16 = vadd.f32 %v3548_v39, %v2232_v23  ;;  %v2337_v32 = vpop.f32.mrb[87].mxu1 }
 0x889   :  { %v2338_v28 = vadd.f32 %v2337_v32, %v2231_v40 }
 0x88a   :  { %2393 = vst [vmem:[#allocation11 + $0x38] sm:$0xff] %v2343_v16 }
 0x88b   :  { %2392 = vst [vmem:[#allocation11 + $0x30] sm:$0xff] %v2338_v28  ;;  %v3551_v38 = vpop.f32.mrb[88].mxu1 }
 0x88c   :  { %v2353_v41 = vadd.f32 %v3551_v38, %v2234_v14  ;;  %v2347_v44 = vpop.f32.mrb[89].mxu1 }
 0x88d   :  { %v2348_v60 = vadd.f32 %v2347_v44, %v2233_v37 }
 0x88e   :  { %2395 = vst [vmem:[#allocation11 + $0x48] sm:$0xff] %v2353_v41 }
 0x88f   :  { %2394 = vst [vmem:[#allocation11 + $0x40] sm:$0xff] %v2348_v60  ;;  %v3554_v45 = vpop.f32.mrb[90].mxu1 }
 0x890   :  { %v2363_v53 = vadd.f32 %v3554_v45, %v2236_v63  ;;  %v2357_v6 = vpop.f32.mrb[91].mxu1 }
 0x891   :  { %v2358_v12 = vadd.f32 %v2357_v6, %v2235_v47 }
 0x892   :  { %2397 = vst [vmem:[#allocation11 + $0x58] sm:$0xff] %v2363_v53 }
 0x893   :  { %2396 = vst [vmem:[#allocation11 + $0x50] sm:$0xff] %v2358_v12  ;;  %v3557_v4 = vpop.f32.mrb[92].mxu1 }
 0x894   :  { %v2373_v9 = vadd.f32 %v3557_v4, %v2238_v5  ;;  %v2367_v17 = vpop.f32.mrb[93].mxu1 }
 0x895   :  { %v2368_v21 = vadd.f32 %v2367_v17, %v2237_v46 }
 0x896   :  { %2399 = vst [vmem:[#allocation11 + $0x68] sm:$0xff] %v2373_v9 }
 0x897   :  { %2398 = vst [vmem:[#allocation11 + $0x60] sm:$0xff] %v2368_v21  ;;  %v3560_v30 = vpop.f32.mrb[94].mxu1 }
 0x898   :  { %v2383_v35 = vadd.f32 %v3560_v30, %v2240_v59  ;;  %v2377_v3 = vpop.f32.mrb[95].mxu1 }
 0x899   :  { %v2378_v49 = vadd.f32 %v2377_v3, %v2239_v31 }
 0x89a   :  { %2401 = vst [vmem:[#allocation11 + $0x78] sm:$0xff] %v2383_v35 }
 0x89b   :  { %2400 = vst [vmem:[#allocation11 + $0x70] sm:$0xff] %v2378_v49 }
 0x89c   :  { %4143 = shalt.err (!%p4140_p2)
}
 0x89d   :  { %s4144_s30 = scalar_lea.hbm %s4895_s9, 2048 }
 0x89e   :  { %p4145_p3 = scmp.ne.s32.totalorder %s4895_s9, %s4144_s30  ;;  %p4148_p4 = scmp.lt.u32.totalorder %s4144_s30, %s4895_s9 }
 0x8a0   :  { %p4150_p5 = pnand %p4148_p4, %p4145_p3 }
 0x8a2   :  { %4153 = shalt.err (!%p4150_p5)
}
 0x8a3   :  { %2413 = dma.vmem_to_hbm [thread:$0]  %s2408_s5, 2048, %s4895_s9, [#allocation4], %s4167_s10, %s4167_s10, %s4168_s14  }
 0x8a4   :  { %4160 = dma.done.wait [#allocation4], 2048  }
 0x8a5   :  { %4161 = vsyncadd [#allocation4], 4294965248 }
 0x8a6   :  { %2417 = vsyncpa [#allocation3], 1 }
 0x8a7   :  { %2418 = vsyncpa [#allocation6], 1 }
 0x8a8   :  { %2419 = vsyncpa [#allocation9], 1 }
 0x8a9   :  { %2420 = vsyncpa [#allocation4], 1 }

</bundles_post_ra>
